<compile_context>
chip_gen: v6e
topology: v6e:2x2x1
jax: 0.10.0
libtpu: 0.0.40
codegen_flags: <defaults>
</compile_context>

<pallas_src>
import functools
import math

import jax
import jax.numpy as jnp
from jax.experimental import pallas as pl
from jax.experimental.pallas import tpu as pltpu

_LN_EPS = 1e-5
_VMEM_LIMIT = 32 * 1024 * 1024


# ----------------------------- Pallas kernels ------------------------------ #

def _mha_ln_kernel(xq_ref, xkv_ref, m_ref,
                   wq_ref, bq_ref, wkv_ref, bkv_ref, wo_ref, bo_ref,
                   g_ref, beta_ref, o_ref, *, n_head, scale, eps):
    """Fused multi-head attention sub-layer for one batch element.

    xq: (1, Lq, D) f32, xkv: (1, Lk, D) f32, mask: (1, Mq, Lk) with Mq in {1, Lq}.
    Weights are bf16; biases / LN params f32 with shape (1, N).
    Output: LayerNorm(xq + MHA(xq, xkv)) -- lane-dense (1, Lq, D).
    """
    xq = xq_ref[0]              # (Lq, D) f32
    xkv = xkv_ref[0]            # (Lk, D) f32
    m = m_ref[0]                # (Mq, Lk) f32

    Lq, D = xq.shape
    Dh = D // n_head

    # Fused projections on the MXU (bf16 operands, f32 accumulation).
    q = jnp.dot(xq.astype(jnp.bfloat16), wq_ref[...],
                preferred_element_type=jnp.float32) + bq_ref[...]
    kv = jnp.dot(xkv.astype(jnp.bfloat16), wkv_ref[...],
                 preferred_element_type=jnp.float32) + bkv_ref[...]
    k = kv[:, :D]
    v = kv[:, D:]

    # Fold the 1/sqrt(Dh) score scale into q (scale * (q @ k^T) == (scale*q) @ k^T).
    q = q * scale

    # Per-head attention; the output projection is folded into the head loop so the
    # accumulator stays lane-dense (Lq, D) and no head concat/transpose is needed.
    o = jnp.zeros((Lq, D), jnp.float32)
    for h in range(n_head):
        qh = q[:, h * Dh:(h + 1) * Dh].astype(jnp.bfloat16)
        kh = k[:, h * Dh:(h + 1) * Dh].astype(jnp.bfloat16)
        vh = v[:, h * Dh:(h + 1) * Dh].astype(jnp.bfloat16)
        # s = qh @ kh^T without materializing the transpose.
        s = jax.lax.dot_general(qh, kh, (((1,), (1,)), ((), ())),
                                preferred_element_type=jnp.float32)
        s = jnp.where(m > 0.5, s, -1e9)          # mask broadcasts over Lq if Mq == 1
        s = s - jnp.max(s, axis=-1, keepdims=True)
        p = jnp.exp(s)
        p = p * pl.reciprocal(jnp.sum(p, axis=-1, keepdims=True), approx=True)
        hv = jnp.dot(p.astype(jnp.bfloat16), vh,
                     preferred_element_type=jnp.float32)          # (Lq, Dh)
        o = o + jnp.dot(hv.astype(jnp.bfloat16),
                        wo_ref[h * Dh:(h + 1) * Dh, :],
                        preferred_element_type=jnp.float32)       # (Lq, D)
    o = o + bo_ref[...]

    # Residual add + LayerNorm epilogue (f32).
    y = xq + o
    mean = jnp.mean(y, axis=-1, keepdims=True)
    var = jnp.mean((y - mean) ** 2, axis=-1, keepdims=True)
    o_ref[0] = (y - mean) * jax.lax.rsqrt(var + eps) * g_ref[...] + beta_ref[...]


def _ffn_ln_kernel(x_ref, w1_ref, b1_ref, w2_ref, b2_ref, g_ref, beta_ref,
                   o_ref, *, eps):
    """Fused position-wise FFN + residual-add + LayerNorm over a (tm, D) row tile."""
    x = x_ref[...]                                                # (tm, D) f32
    h = jnp.dot(x.astype(jnp.bfloat16), w1_ref[...],
                preferred_element_type=jnp.float32) + b1_ref[...]
    h = jnp.maximum(h, 0.0)
    f = jnp.dot(h.astype(jnp.bfloat16), w2_ref[...],
                preferred_element_type=jnp.float32) + b2_ref[...]
    y = x + f
    mean = jnp.mean(y, axis=-1, keepdims=True)
    var = jnp.mean((y - mean) ** 2, axis=-1, keepdims=True)
    o_ref[...] = (y - mean) * jax.lax.rsqrt(var + eps) * g_ref[...] + beta_ref[...]


# --------------------------- Pallas call wrappers --------------------------- #

def fused_mha_ln(x_q, x_kv, mask, p, gamma, beta, n_head, eps=_LN_EPS):
    """LayerNorm(x_q + MultiHeadAttention(x_q, x_kv, x_kv, mask)). Grid over batch."""
    B, Lq, D = x_q.shape
    Lk = x_kv.shape[1]
    # Compact mask: drop the head axis -> (B, Mq, Lk), Mq in {1, Lq}; no (B,Lq,Lk)
    # broadcast is materialized in HBM.
    mask3 = mask[:, 0].astype(jnp.float32)
    Mq = mask3.shape[1]
    scale = 1.0 / math.sqrt(D // n_head)

    kernel = functools.partial(_mha_ln_kernel, n_head=n_head, scale=scale, eps=eps)
    return pl.pallas_call(
        kernel,
        grid=(B,),
        in_specs=[
            pl.BlockSpec((1, Lq, D), lambda b: (b, 0, 0)),
            pl.BlockSpec((1, Lk, D), lambda b: (b, 0, 0)),
            pl.BlockSpec((1, Mq, Lk), lambda b: (b, 0, 0)),
            pl.BlockSpec((D, D), lambda b: (0, 0)),        # wq (bf16)
            pl.BlockSpec((1, D), lambda b: (0, 0)),        # bq
            pl.BlockSpec((D, 2 * D), lambda b: (0, 0)),    # wkv (bf16, concat K|V)
            pl.BlockSpec((1, 2 * D), lambda b: (0, 0)),    # bkv
            pl.BlockSpec((D, D), lambda b: (0, 0)),        # wo (bf16)
            pl.BlockSpec((1, D), lambda b: (0, 0)),        # bo
            pl.BlockSpec((1, D), lambda b: (0, 0)),        # ln gamma
            pl.BlockSpec((1, D), lambda b: (0, 0)),        # ln beta
        ],
        out_specs=pl.BlockSpec((1, Lq, D), lambda b: (b, 0, 0)),
        out_shape=jax.ShapeDtypeStruct((B, Lq, D), jnp.float32),
        compiler_params=pltpu.CompilerParams(
            dimension_semantics=("parallel",),
            vmem_limit_bytes=_VMEM_LIMIT),
    )(x_q, x_kv, mask3,
      p["wq"], p["bq"], p["wkv"], p["bkv"], p["wo"], p["bo"], gamma, beta)


def _row_tile(M):
    for tm in (512, 256, 128, 64, 32, 16, 8):
        if M % tm == 0:
            return tm
    return M


def fused_ffn_ln(x, w1, b1, w2, b2, gamma, beta, eps=_LN_EPS):
    """LayerNorm(x + FFN(x)), tiled over rows of (batch*seq)."""
    B, L, D = x.shape
    F = w1.shape[1]
    M = B * L
    tm = _row_tile(M)
    x2 = x.reshape(M, D)
    # TODO(synk): for very large D/F add a K grid axis with a VMEM accumulator; at
    #             transformer-typical sizes the full weights fit comfortably in VMEM.
    out = pl.pallas_call(
        functools.partial(_ffn_ln_kernel, eps=eps),
        grid=(M // tm,),
        in_specs=[
            pl.BlockSpec((tm, D), lambda i: (i, 0)),
            pl.BlockSpec((D, F), lambda i: (0, 0)),        # w1 (bf16)
            pl.BlockSpec((1, F), lambda i: (0, 0)),        # b1
            pl.BlockSpec((F, D), lambda i: (0, 0)),        # w2 (bf16)
            pl.BlockSpec((1, D), lambda i: (0, 0)),        # b2
            pl.BlockSpec((1, D), lambda i: (0, 0)),        # ln gamma
            pl.BlockSpec((1, D), lambda i: (0, 0)),        # ln beta
        ],
        out_specs=pl.BlockSpec((tm, D), lambda i: (i, 0)),
        out_shape=jax.ShapeDtypeStruct((M, D), jnp.float32),
        compiler_params=pltpu.CompilerParams(
            dimension_semantics=("parallel",),
            vmem_limit_bytes=_VMEM_LIMIT),
    )(x2, w1, b1, w2, b2, gamma, beta)
    return out.reshape(B, L, D)


# ------------------------------ Model pieces -------------------------------- #

def sinusoidal_pe(max_len, d_model):
    pos = jnp.arange(max_len, dtype=jnp.float32)[:, None]
    i = jnp.arange(0, d_model, 2, dtype=jnp.float32)[None, :]
    angle = pos / jnp.power(10000.0, i / d_model)
    pe = jnp.zeros((max_len, d_model), jnp.float32)
    pe = pe.at[:, 0::2].set(jnp.sin(angle))
    pe = pe.at[:, 1::2].set(jnp.cos(angle))
    return pe


def embed(tokens, tok_emb, pe):
    # Token gather + positional encoding (glue, not a hot matmul path).
    x = jnp.take(tok_emb, tokens, axis=0)
    return x + pe[None, : tokens.shape[1], :]   # dropout = identity (eval mode)


def encoder_decoder_forward(params, src, tgt, src_mask, tgt_mask, n_head):
    # encode
    x = embed(src, params["src_tok_emb"], params["pe"])
    for lp in params["enc_layers"]:
        x = fused_mha_ln(x, x, src_mask, lp["self_attn"], lp["ln1_g"], lp["ln1_b"], n_head)
        x = fused_ffn_ln(x, lp["ffn_w1"], lp["ffn_b1"], lp["ffn_w2"], lp["ffn_b2"],
                         lp["ln2_g"], lp["ln2_b"])
    memory = x
    # decode
    y = embed(tgt, params["tgt_tok_emb"], params["pe"])
    for lp in params["dec_layers"]:
        y = fused_mha_ln(y, y, tgt_mask, lp["self_attn"], lp["ln1_g"], lp["ln1_b"], n_head)
        y = fused_mha_ln(y, memory, src_mask, lp["cross_attn"], lp["ln2_g"], lp["ln2_b"], n_head)
        y = fused_ffn_ln(y, lp["ffn_w1"], lp["ffn_b1"], lp["ffn_w2"], lp["ffn_b2"],
                         lp["ln3_g"], lp["ln3_b"])
    return y


# ---------------------- Pure-JAX reference (f32 math) ----------------------- #

def _ref_mha_ln(x_q, x_kv, mask, p, gamma, beta, n_head, eps=_LN_EPS):
    B, Lq, D = x_q.shape
    Lk = x_kv.shape[1]
    Dh = D // n_head
    wq = p["wq"].astype(jnp.float32)
    wkv = p["wkv"].astype(jnp.float32)
    wo = p["wo"].astype(jnp.float32)
    q = x_q @ wq + p["bq"]
    kv = x_kv @ wkv + p["bkv"]
    k, v = kv[..., :D], kv[..., D:]
    q = q.reshape(B, Lq, n_head, Dh).transpose(0, 2, 1, 3)
    k = k.reshape(B, Lk, n_head, Dh).transpose(0, 2, 1, 3)
    v = v.reshape(B, Lk, n_head, Dh).transpose(0, 2, 1, 3)
    s = jnp.einsum("bhqd,bhkd->bhqk", q, k) / math.sqrt(Dh)
    s = jnp.where(mask > 0.5, s, -1e9)
    a = jax.nn.softmax(s, axis=-1)
    o = jnp.einsum("bhqk,bhkd->bhqd", a, v).transpose(0, 2, 1, 3).reshape(B, Lq, D)
    o = o @ wo + p["bo"]
    y = x_q + o
    mean = y.mean(-1, keepdims=True)
    var = ((y - mean) ** 2).mean(-1, keepdims=True)
    return (y - mean) * jax.lax.rsqrt(var + eps) * gamma + beta


def _ref_ffn_ln(x, w1, b1, w2, b2, gamma, beta, eps=_LN_EPS):
    h = jnp.maximum(x @ w1.astype(jnp.float32) + b1, 0.0)
    f = h @ w2.astype(jnp.float32) + b2
    y = x + f
    mean = y.mean(-1, keepdims=True)
    var = ((y - mean) ** 2).mean(-1, keepdims=True)
    return (y - mean) * jax.lax.rsqrt(var + eps) * gamma + beta


def reference_forward(params, src, tgt, src_mask, tgt_mask, n_head):
    x = embed(src, params["src_tok_emb"], params["pe"])
    for lp in params["enc_layers"]:
        x = _ref_mha_ln(x, x, src_mask, lp["self_attn"], lp["ln1_g"], lp["ln1_b"], n_head)
        x = _ref_ffn_ln(x, lp["ffn_w1"], lp["ffn_b1"], lp["ffn_w2"], lp["ffn_b2"],
                        lp["ln2_g"], lp["ln2_b"])
    memory = x
    y = embed(tgt, params["tgt_tok_emb"], params["pe"])
    for lp in params["dec_layers"]:
        y = _ref_mha_ln(y, y, tgt_mask, lp["self_attn"], lp["ln1_g"], lp["ln1_b"], n_head)
        y = _ref_mha_ln(y, memory, src_mask, lp["cross_attn"], lp["ln2_g"], lp["ln2_b"], n_head)
        y = _ref_ffn_ln(y, lp["ffn_w1"], lp["ffn_b1"], lp["ffn_w2"], lp["ffn_b2"],
                        lp["ln3_g"], lp["ln3_b"])
    return y


# ---------------------------- Parameter creation ---------------------------- #

def _dense(key, fan_in, fan_out):
    kw, kb = jax.random.split(key)
    bound = 1.0 / math.sqrt(fan_in)
    w = jax.random.uniform(kw, (fan_in, fan_out), jnp.float32, -bound, bound)
    b = jax.random.uniform(kb, (fan_out,), jnp.float32, -bound, bound)
    return w, b


def _attn_params(key, d_model):
    ks = jax.random.split(key, 4)
    wq, bq = _dense(ks[0], d_model, d_model)
    wk, bk = _dense(ks[1], d_model, d_model)
    wv, bv = _dense(ks[2], d_model, d_model)
    wo, bo = _dense(ks[3], d_model, d_model)
    return dict(
        wq=wq.astype(jnp.bfloat16), bq=bq.reshape(1, -1),
        wkv=jnp.concatenate([wk, wv], axis=1).astype(jnp.bfloat16),
        bkv=jnp.concatenate([bk, bv]).reshape(1, -1),
        wo=wo.astype(jnp.bfloat16), bo=bo.reshape(1, -1),
    )


def _ln_pair(d_model):
    return jnp.ones((1, d_model), jnp.float32), jnp.zeros((1, d_model), jnp.float32)


def init_params(key, src_vocab, tgt_vocab, d_model, ffn_hidden, n_layers, max_len):
    keys = jax.random.split(key, 3 + 2 * n_layers)
    params = {
        "src_tok_emb": 0.02 * jax.random.normal(keys[0], (src_vocab, d_model), jnp.float32),
        "tgt_tok_emb": 0.02 * jax.random.normal(keys[1], (tgt_vocab, d_model), jnp.float32),
        "pe": sinusoidal_pe(max_len, d_model),
        "enc_layers": [],
        "dec_layers": [],
    }
    for l in range(n_layers):
        k = jax.random.split(keys[3 + l], 3)
        w1, b1 = _dense(k[1], d_model, ffn_hidden)
        w2, b2 = _dense(k[2], ffn_hidden, d_model)
        g1, bt1 = _ln_pair(d_model)
        g2, bt2 = _ln_pair(d_model)
        params["enc_layers"].append(dict(
            self_attn=_attn_params(k[0], d_model),
            ffn_w1=w1.astype(jnp.bfloat16), ffn_b1=b1.reshape(1, -1),
            ffn_w2=w2.astype(jnp.bfloat16), ffn_b2=b2.reshape(1, -1),
            ln1_g=g1, ln1_b=bt1, ln2_g=g2, ln2_b=bt2,
        ))
    for l in range(n_layers):
        k = jax.random.split(keys[3 + n_layers + l], 4)
        w1, b1 = _dense(k[2], d_model, ffn_hidden)
        w2, b2 = _dense(k[3], ffn_hidden, d_model)
        g1, bt1 = _ln_pair(d_model)
        g2, bt2 = _ln_pair(d_model)
        g3, bt3 = _ln_pair(d_model)
        params["dec_layers"].append(dict(
            self_attn=_attn_params(k[0], d_model),
            cross_attn=_attn_params(k[1], d_model),
            ffn_w1=w1.astype(jnp.bfloat16), ffn_b1=b1.reshape(1, -1),
            ffn_w2=w2.astype(jnp.bfloat16), ffn_b2=b2.reshape(1, -1),
            ln1_g=g1, ln1_b=bt1, ln2_g=g2, ln2_b=bt2, ln3_g=g3, ln3_b=bt3,
        ))
    return params


# ----------------------------------- Main ----------------------------------- #

if __name__ == "__main__":
    # Small config consistent with EncoderDecoder(__init__) signature.
    SRC_VOCAB, TGT_VOCAB = 16, 16
    D_MODEL, N_HEAD, FFN_HIDDEN, N_LAYERS = 32, 4, 64, 2
    MAX_LEN = 32
    B, LS, LT = 2, 8, 8

    key = jax.random.PRNGKey(0)
    k_par, k_src, k_tgt = jax.random.split(key, 3)

    params = init_params(k_par, SRC_VOCAB, TGT_VOCAB, D_MODEL, FFN_HIDDEN,
                         N_LAYERS, MAX_LEN)

    src = jax.random.randint(k_src, (B, LS), 0, SRC_VOCAB)
    tgt = jax.random.randint(k_tgt, (B, LT), 0, TGT_VOCAB)

    # src_mask: all positions valid; tgt_mask: causal (subsequent) mask.
    src_mask = jnp.ones((B, 1, 1, LS), jnp.float32)
    causal = jnp.tril(jnp.ones((LT, LT), jnp.float32))
    tgt_mask = jnp.broadcast_to(causal[None, None], (B, 1, LT, LT))

    fwd = jax.jit(functools.partial(encoder_decoder_forward, n_head=N_HEAD))
    out = fwd(params, src, tgt, src_mask, tgt_mask)
    out = jax.block_until_ready(out)

    assert out.shape == (B, LT, D_MODEL)
    assert bool(jnp.all(jnp.isfinite(out)))

    # Loose cross-check against a pure-JAX f32 reference (kernel matmuls use bf16
    # operands with f32 accumulation, so exact equality is not expected).
    ref = reference_forward(params, src, tgt, src_mask, tgt_mask, N_HEAD)
    max_err = float(jnp.max(jnp.abs(out - ref)))
    assert max_err < 0.5, f"kernel/reference mismatch: max |diff| = {max_err}"

    print("KERNEL_OK")
</pallas_src>

<mosaic_0001>
module attributes {stable_mosaic.version = 11 : i64} {
  func.func @_ffn_ln_kernel(%arg0: i32, %arg1: memref<16x32xf32, #tpu.memory_space<vmem>>, %arg2: memref<32x64xbf16, #tpu.memory_space<vmem>>, %arg3: memref<1x64xf32, #tpu.memory_space<vmem>>, %arg4: memref<64x32xbf16, #tpu.memory_space<vmem>>, %arg5: memref<1x32xf32, #tpu.memory_space<vmem>>, %arg6: memref<1x32xf32, #tpu.memory_space<vmem>>, %arg7: memref<1x32xf32, #tpu.memory_space<vmem>>, %arg8: memref<16x32xf32, #tpu.memory_space<vmem>>) attributes {dimension_semantics = [#tpu.dimension_semantics<parallel>], iteration_bounds = array<i64: 1>, scalar_prefetch = 0 : i64, scratch_operands = 0 : i64, tpu.core_type = #tpu.core_type<tc>, window_params = [{transform_indices = @transform_0, window_bounds = array<i64: 16, 32>}, {pipeline_mode = #tpu.pipeline_mode<synchronous>, transform_indices = @transform_1, window_bounds = array<i64: 32, 64>}, {pipeline_mode = #tpu.pipeline_mode<synchronous>, transform_indices = @transform_2, window_bounds = array<i64: 1, 64>}, {pipeline_mode = #tpu.pipeline_mode<synchronous>, transform_indices = @transform_3, window_bounds = array<i64: 64, 32>}, {pipeline_mode = #tpu.pipeline_mode<synchronous>, transform_indices = @transform_4, window_bounds = array<i64: 1, 32>}, {pipeline_mode = #tpu.pipeline_mode<synchronous>, transform_indices = @transform_5, window_bounds = array<i64: 1, 32>}, {pipeline_mode = #tpu.pipeline_mode<synchronous>, transform_indices = @transform_6, window_bounds = array<i64: 1, 32>}, {transform_indices = @transform_7, window_bounds = array<i64: 16, 32>}]} {
    %c0 = arith.constant 0 : index
    %c0_0 = arith.constant 0 : index
    %0 = vector.load %arg1[%c0, %c0_0] : memref<16x32xf32, #tpu.memory_space<vmem>>, vector<16x32xf32>
    %1 = arith.truncf %0 : vector<16x32xf32> to vector<16x32xbf16>
    %c0_1 = arith.constant 0 : index
    %c0_2 = arith.constant 0 : index
    %2 = vector.load %arg2[%c0_1, %c0_2] : memref<32x64xbf16, #tpu.memory_space<vmem>>, vector<32x64xbf16>
    %cst = arith.constant dense<0.000000e+00> : vector<16x64xf32>
    %3 = tpu.matmul %1, %2, %cst {dimension_numbers = #tpu.dot_dimension_numbers<[1], [0], [0], [1], [0, 0, 1, 1], [], []>} : vector<16x32xbf16>, vector<32x64xbf16>, vector<16x64xf32> -> vector<16x64xf32>
    %c0_3 = arith.constant 0 : index
    %c0_4 = arith.constant 0 : index
    %4 = vector.load %arg3[%c0_3, %c0_4] : memref<1x64xf32, #tpu.memory_space<vmem>>, vector<1x64xf32>
    %5 = vector.broadcast %4 : vector<1x64xf32> to vector<16x64xf32>
    %6 = arith.addf %3, %5 : vector<16x64xf32>
    %cst_5 = arith.constant 0.000000e+00 : f32
    %7 = vector.broadcast %cst_5 : f32 to vector<16x64xf32>
    %8 = arith.maximumf %6, %7 : vector<16x64xf32>
    %9 = arith.truncf %8 : vector<16x64xf32> to vector<16x64xbf16>
    %c0_6 = arith.constant 0 : index
    %c0_7 = arith.constant 0 : index
    %10 = vector.load %arg4[%c0_6, %c0_7] : memref<64x32xbf16, #tpu.memory_space<vmem>>, vector<64x32xbf16>
    %cst_8 = arith.constant dense<0.000000e+00> : vector<16x32xf32>
    %11 = tpu.matmul %9, %10, %cst_8 {dimension_numbers = #tpu.dot_dimension_numbers<[1], [0], [0], [1], [0, 0, 1, 1], [], []>} : vector<16x64xbf16>, vector<64x32xbf16>, vector<16x32xf32> -> vector<16x32xf32>
    %c0_9 = arith.constant 0 : index
    %c0_10 = arith.constant 0 : index
    %12 = vector.load %arg5[%c0_9, %c0_10] : memref<1x32xf32, #tpu.memory_space<vmem>>, vector<1x32xf32>
    %13 = vector.broadcast %12 : vector<1x32xf32> to vector<16x32xf32>
    %14 = arith.addf %11, %13 : vector<16x32xf32>
    %15 = arith.addf %0, %14 : vector<16x32xf32>
    %cst_11 = arith.constant dense<0.000000e+00> : vector<16xf32>
    %16 = vector.multi_reduction <add>, %15, %cst_11 [1] : vector<16x32xf32> to vector<16xf32>
    %17 = vector.shape_cast %16 : vector<16xf32> to vector<16x1xf32>
    %cst_12 = arith.constant 3.200000e+01 : f32
    %18 = vector.broadcast %cst_12 : f32 to vector<16x1xf32>
    %19 = arith.divf %17, %18 : vector<16x1xf32>
    %20 = vector.broadcast %19 : vector<16x1xf32> to vector<16x32xf32>
    %21 = arith.subf %15, %20 : vector<16x32xf32>
    %22 = arith.mulf %21, %21 : vector<16x32xf32>
    %cst_13 = arith.constant dense<0.000000e+00> : vector<16xf32>
    %23 = vector.multi_reduction <add>, %22, %cst_13 [1] : vector<16x32xf32> to vector<16xf32>
    %24 = vector.shape_cast %23 : vector<16xf32> to vector<16x1xf32>
    %cst_14 = arith.constant 3.200000e+01 : f32
    %25 = vector.broadcast %cst_14 : f32 to vector<16x1xf32>
    %26 = arith.divf %24, %25 : vector<16x1xf32>
    %27 = vector.broadcast %19 : vector<16x1xf32> to vector<16x32xf32>
    %28 = arith.subf %15, %27 : vector<16x32xf32>
    %cst_15 = arith.constant 9.99999974E-6 : f32
    %29 = vector.broadcast %cst_15 : f32 to vector<16x1xf32>
    %30 = arith.addf %26, %29 : vector<16x1xf32>
    %31 = math.rsqrt %30 : vector<16x1xf32>
    %32 = vector.broadcast %31 : vector<16x1xf32> to vector<16x32xf32>
    %33 = arith.mulf %28, %32 : vector<16x32xf32>
    %c0_16 = arith.constant 0 : index
    %c0_17 = arith.constant 0 : index
    %34 = vector.load %arg6[%c0_16, %c0_17] : memref<1x32xf32, #tpu.memory_space<vmem>>, vector<1x32xf32>
    %35 = vector.broadcast %34 : vector<1x32xf32> to vector<16x32xf32>
    %36 = arith.mulf %33, %35 : vector<16x32xf32>
    %c0_18 = arith.constant 0 : index
    %c0_19 = arith.constant 0 : index
    %37 = vector.load %arg7[%c0_18, %c0_19] : memref<1x32xf32, #tpu.memory_space<vmem>>, vector<1x32xf32>
    %38 = vector.broadcast %37 : vector<1x32xf32> to vector<16x32xf32>
    %39 = arith.addf %36, %38 : vector<16x32xf32>
    %c0_20 = arith.constant 0 : index
    %c0_21 = arith.constant 0 : index
    %40 = vector.load %arg8[%c0_20, %c0_21] : memref<16x32xf32, #tpu.memory_space<vmem>>, vector<16x32xf32>
    tpu.vector_store %arg8[%c0_20, %c0_21], %39 {strides = array<i32>} : memref<16x32xf32, #tpu.memory_space<vmem>>, vector<16x32xf32>,
    return
  }
  func.func @transform_0(%arg0: i32) -> (i32, i32) {
    %c0_i32 = arith.constant 0 : i32
    %c0_i32_0 = arith.constant 0 : i32
    return %arg0, %c0_i32 : i32, i32
  }
  func.func @transform_1(%arg0: i32) -> (i32, i32) {
    %c0_i32 = arith.constant 0 : i32
    %c0_i32_0 = arith.constant 0 : i32
    %c0_i32_1 = arith.constant 0 : i32
    return %c0_i32, %c0_i32_0 : i32, i32
  }
  func.func @transform_2(%arg0: i32) -> (i32, i32) {
    %c0_i32 = arith.constant 0 : i32
    %c0_i32_0 = arith.constant 0 : i32
    %c0_i32_1 = arith.constant 0 : i32
    return %c0_i32, %c0_i32_0 : i32, i32
  }
  func.func @transform_3(%arg0: i32) -> (i32, i32) {
    %c0_i32 = arith.constant 0 : i32
    %c0_i32_0 = arith.constant 0 : i32
    %c0_i32_1 = arith.constant 0 : i32
    return %c0_i32, %c0_i32_0 : i32, i32
  }
  func.func @transform_4(%arg0: i32) -> (i32, i32) {
    %c0_i32 = arith.constant 0 : i32
    %c0_i32_0 = arith.constant 0 : i32
    %c0_i32_1 = arith.constant 0 : i32
    return %c0_i32, %c0_i32_0 : i32, i32
  }
  func.func @transform_5(%arg0: i32) -> (i32, i32) {
    %c0_i32 = arith.constant 0 : i32
    %c0_i32_0 = arith.constant 0 : i32
    %c0_i32_1 = arith.constant 0 : i32
    return %c0_i32, %c0_i32_0 : i32, i32
  }
  func.func @transform_6(%arg0: i32) -> (i32, i32) {
    %c0_i32 = arith.constant 0 : i32
    %c0_i32_0 = arith.constant 0 : i32
    %c0_i32_1 = arith.constant 0 : i32
    return %c0_i32, %c0_i32_0 : i32, i32
  }
  func.func @transform_7(%arg0: i32) -> (i32, i32) {
    %c0_i32 = arith.constant 0 : i32
    %c0_i32_0 = arith.constant 0 : i32
    return %arg0, %c0_i32 : i32, i32
  }
}

module attributes {stable_mosaic.version = 11 : i64} {
  func.func @_mha_ln_kernel(%arg0: i32, %arg1: memref<1x8x32xf32, #tpu.memory_space<vmem>>, %arg2: memref<1x8x32xf32, #tpu.memory_space<vmem>>, %arg3: memref<1x8x8xf32, #tpu.memory_space<vmem>>, %arg4: memref<32x32xbf16, #tpu.memory_space<vmem>>, %arg5: memref<1x32xf32, #tpu.memory_space<vmem>>, %arg6: memref<32x64xbf16, #tpu.memory_space<vmem>>, %arg7: memref<1x64xf32, #tpu.memory_space<vmem>>, %arg8: memref<32x32xbf16, #tpu.memory_space<vmem>>, %arg9: memref<1x32xf32, #tpu.memory_space<vmem>>, %arg10: memref<1x32xf32, #tpu.memory_space<vmem>>, %arg11: memref<1x32xf32, #tpu.memory_space<vmem>>, %arg12: memref<1x8x32xf32, #tpu.memory_space<vmem>>) attributes {dimension_semantics = [#tpu.dimension_semantics<parallel>], iteration_bounds = array<i64: 2>, scalar_prefetch = 0 : i64, scratch_operands = 0 : i64, tpu.core_type = #tpu.core_type<tc>, window_params = [{transform_indices = @transform_0, window_bounds = array<i64: 1, 8, 32>}, {transform_indices = @transform_1, window_bounds = array<i64: 1, 8, 32>}, {transform_indices = @transform_2, window_bounds = array<i64: 1, 8, 8>}, {pipeline_mode = #tpu.pipeline_mode<synchronous>, transform_indices = @transform_3, window_bounds = array<i64: 32, 32>}, {pipeline_mode = #tpu.pipeline_mode<synchronous>, transform_indices = @transform_4, window_bounds = array<i64: 1, 32>}, {pipeline_mode = #tpu.pipeline_mode<synchronous>, transform_indices = @transform_5, window_bounds = array<i64: 32, 64>}, {pipeline_mode = #tpu.pipeline_mode<synchronous>, transform_indices = @transform_6, window_bounds = array<i64: 1, 64>}, {pipeline_mode = #tpu.pipeline_mode<synchronous>, transform_indices = @transform_7, window_bounds = array<i64: 32, 32>}, {pipeline_mode = #tpu.pipeline_mode<synchronous>, transform_indices = @transform_8, window_bounds = array<i64: 1, 32>}, {pipeline_mode = #tpu.pipeline_mode<synchronous>, transform_indices = @transform_9, window_bounds = array<i64: 1, 32>}, {pipeline_mode = #tpu.pipeline_mode<synchronous>, transform_indices = @transform_10, window_bounds = array<i64: 1, 32>}, {transform_indices = @transform_11, window_bounds = array<i64: 1, 8, 32>}]} {
    %c0 = arith.constant 0 : index
    %c0_0 = arith.constant 0 : index
    %c0_1 = arith.constant 0 : index
    %0 = vector.load %arg1[%c0, %c0_0, %c0_1] : memref<1x8x32xf32, #tpu.memory_space<vmem>>, vector<1x8x32xf32>
    %1 = vector.shape_cast %0 : vector<1x8x32xf32> to vector<8x32xf32>
    %c0_2 = arith.constant 0 : index
    %c0_3 = arith.constant 0 : index
    %c0_4 = arith.constant 0 : index
    %2 = vector.load %arg2[%c0_2, %c0_3, %c0_4] : memref<1x8x32xf32, #tpu.memory_space<vmem>>, vector<1x8x32xf32>
    %3 = vector.shape_cast %2 : vector<1x8x32xf32> to vector<8x32xf32>
    %c0_5 = arith.constant 0 : index
    %c0_6 = arith.constant 0 : index
    %c0_7 = arith.constant 0 : index
    %4 = vector.load %arg3[%c0_5, %c0_6, %c0_7] : memref<1x8x8xf32, #tpu.memory_space<vmem>>, vector<1x8x8xf32>
    %5 = vector.shape_cast %4 : vector<1x8x8xf32> to vector<8x8xf32>
    %6 = arith.truncf %1 : vector<8x32xf32> to vector<8x32xbf16>
    %c0_8 = arith.constant 0 : index
    %c0_9 = arith.constant 0 : index
    %7 = vector.load %arg4[%c0_8, %c0_9] : memref<32x32xbf16, #tpu.memory_space<vmem>>, vector<32x32xbf16>
    %cst = arith.constant dense<0.000000e+00> : vector<8x32xf32>
    %8 = tpu.matmul %6, %7, %cst {dimension_numbers = #tpu.dot_dimension_numbers<[1], [0], [0], [1], [0, 0, 1, 1], [], []>} : vector<8x32xbf16>, vector<32x32xbf16>, vector<8x32xf32> -> vector<8x32xf32>
    %c0_10 = arith.constant 0 : index
    %c0_11 = arith.constant 0 : index
    %9 = vector.load %arg5[%c0_10, %c0_11] : memref<1x32xf32, #tpu.memory_space<vmem>>, vector<1x32xf32>
    %10 = vector.broadcast %9 : vector<1x32xf32> to vector<8x32xf32>
    %11 = arith.addf %8, %10 : vector<8x32xf32>
    %12 = arith.truncf %3 : vector<8x32xf32> to vector<8x32xbf16>
    %c0_12 = arith.constant 0 : index
    %c0_13 = arith.constant 0 : index
    %13 = vector.load %arg6[%c0_12, %c0_13] : memref<32x64xbf16, #tpu.memory_space<vmem>>, vector<32x64xbf16>
    %cst_14 = arith.constant dense<0.000000e+00> : vector<8x64xf32>
    %14 = tpu.matmul %12, %13, %cst_14 {dimension_numbers = #tpu.dot_dimension_numbers<[1], [0], [0], [1], [0, 0, 1, 1], [], []>} : vector<8x32xbf16>, vector<32x64xbf16>, vector<8x64xf32> -> vector<8x64xf32>
    %c0_15 = arith.constant 0 : index
    %c0_16 = arith.constant 0 : index
    %15 = vector.load %arg7[%c0_15, %c0_16] : memref<1x64xf32, #tpu.memory_space<vmem>>, vector<1x64xf32>
    %16 = vector.broadcast %15 : vector<1x64xf32> to vector<8x64xf32>
    %17 = arith.addf %14, %16 : vector<8x64xf32>
    %18 = vector.extract_strided_slice %17 {offsets = [0, 0], sizes = [8, 32], strides = [1, 1]} : vector<8x64xf32> to vector<8x32xf32>
    %19 = vector.extract_strided_slice %17 {offsets = [0, 32], sizes = [8, 32], strides = [1, 1]} : vector<8x64xf32> to vector<8x32xf32>
    %cst_17 = arith.constant 0.353553385 : f32
    %20 = vector.broadcast %cst_17 : f32 to vector<8x32xf32>
    %21 = arith.mulf %11, %20 : vector<8x32xf32>
    %cst_18 = arith.constant 0.000000e+00 : f32
    %22 = vector.broadcast %cst_18 : f32 to vector<8x32xf32>
    %23 = vector.extract_strided_slice %21 {offsets = [0, 0], sizes = [8, 8], strides = [1, 1]} : vector<8x32xf32> to vector<8x8xf32>
    %24 = arith.truncf %23 : vector<8x8xf32> to vector<8x8xbf16>
    %25 = vector.extract_strided_slice %18 {offsets = [0, 0], sizes = [8, 8], strides = [1, 1]} : vector<8x32xf32> to vector<8x8xf32>
    %26 = arith.truncf %25 : vector<8x8xf32> to vector<8x8xbf16>
    %27 = vector.extract_strided_slice %19 {offsets = [0, 0], sizes = [8, 8], strides = [1, 1]} : vector<8x32xf32> to vector<8x8xf32>
    %28 = arith.truncf %27 : vector<8x8xf32> to vector<8x8xbf16>
    %cst_19 = arith.constant dense<0.000000e+00> : vector<8x8xf32>
    %29 = tpu.matmul %24, %26, %cst_19 {dimension_numbers = #tpu.dot_dimension_numbers<[1], [1], [0], [0], [0, 0, 1, 0], [], []>} : vector<8x8xbf16>, vector<8x8xbf16>, vector<8x8xf32> -> vector<8x8xf32>
    %cst_20 = arith.constant 5.000000e-01 : f32
    %30 = vector.broadcast %cst_20 : f32 to vector<8x8xf32>
    %31 = arith.cmpf ogt, %5, %30 : vector<8x8xf32>
    %cst_21 = arith.constant -1.000000e+09 : f32
    %32 = vector.broadcast %cst_21 : f32 to vector<8x8xf32>
    %33 = arith.select %31, %29, %32 : vector<8x8xi1>, vector<8x8xf32>
    %cst_22 = arith.constant dense<0xFF800000> : vector<8xf32>
    %34 = vector.multi_reduction <maximumf>, %33, %cst_22 [1] : vector<8x8xf32> to vector<8xf32>
    %35 = vector.shape_cast %34 : vector<8xf32> to vector<8x1xf32>
    %36 = vector.broadcast %35 : vector<8x1xf32> to vector<8x8xf32>
    %37 = arith.subf %33, %36 : vector<8x8xf32>
    %38 = math.exp %37 : vector<8x8xf32>
    %cst_23 = arith.constant dense<0.000000e+00> : vector<8xf32>
    %39 = vector.multi_reduction <add>, %38, %cst_23 [1] : vector<8x8xf32> to vector<8xf32>
    %40 = vector.shape_cast %39 : vector<8xf32> to vector<8x1xf32>
    %41 = tpu.reciprocal %40 {approx = true} : vector<8x1xf32> -> vector<8x1xf32>
    %42 = vector.broadcast %41 : vector<8x1xf32> to vector<8x8xf32>
    %43 = arith.mulf %38, %42 : vector<8x8xf32>
    %44 = arith.truncf %43 : vector<8x8xf32> to vector<8x8xbf16>
    %cst_24 = arith.constant dense<0.000000e+00> : vector<8x8xf32>
    %45 = tpu.matmul %44, %28, %cst_24 {dimension_numbers = #tpu.dot_dimension_numbers<[1], [0], [0], [1], [0, 0, 1, 1], [], []>} : vector<8x8xbf16>, vector<8x8xbf16>, vector<8x8xf32> -> vector<8x8xf32>
    %46 = arith.truncf %45 : vector<8x8xf32> to vector<8x8xbf16>
    %c0_25 = arith.constant 0 : index
    %c0_26 = arith.constant 0 : index
    %47 = vector.load %arg8[%c0_25, %c0_26] : memref<32x32xbf16, #tpu.memory_space<vmem>>, vector<8x32xbf16>
    %cst_27 = arith.constant dense<0.000000e+00> : vector<8x32xf32>
    %48 = tpu.matmul %46, %47, %cst_27 {dimension_numbers = #tpu.dot_dimension_numbers<[1], [0], [0], [1], [0, 0, 1, 1], [], []>} : vector<8x8xbf16>, vector<8x32xbf16>, vector<8x32xf32> -> vector<8x32xf32>
    %49 = arith.addf %22, %48 : vector<8x32xf32>
    %50 = vector.extract_strided_slice %21 {offsets = [0, 8], sizes = [8, 8], strides = [1, 1]} : vector<8x32xf32> to vector<8x8xf32>
    %51 = arith.truncf %50 : vector<8x8xf32> to vector<8x8xbf16>
    %52 = vector.extract_strided_slice %18 {offsets = [0, 8], sizes = [8, 8], strides = [1, 1]} : vector<8x32xf32> to vector<8x8xf32>
    %53 = arith.truncf %52 : vector<8x8xf32> to vector<8x8xbf16>
    %54 = vector.extract_strided_slice %19 {offsets = [0, 8], sizes = [8, 8], strides = [1, 1]} : vector<8x32xf32> to vector<8x8xf32>
    %55 = arith.truncf %54 : vector<8x8xf32> to vector<8x8xbf16>
    %cst_28 = arith.constant dense<0.000000e+00> : vector<8x8xf32>
    %56 = tpu.matmul %51, %53, %cst_28 {dimension_numbers = #tpu.dot_dimension_numbers<[1], [1], [0], [0], [0, 0, 1, 0], [], []>} : vector<8x8xbf16>, vector<8x8xbf16>, vector<8x8xf32> -> vector<8x8xf32>
    %cst_29 = arith.constant 5.000000e-01 : f32
    %57 = vector.broadcast %cst_29 : f32 to vector<8x8xf32>
    %58 = arith.cmpf ogt, %5, %57 : vector<8x8xf32>
    %cst_30 = arith.constant -1.000000e+09 : f32
    %59 = vector.broadcast %cst_30 : f32 to vector<8x8xf32>
    %60 = arith.select %58, %56, %59 : vector<8x8xi1>, vector<8x8xf32>
    %cst_31 = arith.constant dense<0xFF800000> : vector<8xf32>
    %61 = vector.multi_reduction <maximumf>, %60, %cst_31 [1] : vector<8x8xf32> to vector<8xf32>
    %62 = vector.shape_cast %61 : vector<8xf32> to vector<8x1xf32>
    %63 = vector.broadcast %62 : vector<8x1xf32> to vector<8x8xf32>
    %64 = arith.subf %60, %63 : vector<8x8xf32>
    %65 = math.exp %64 : vector<8x8xf32>
    %cst_32 = arith.constant dense<0.000000e+00> : vector<8xf32>
    %66 = vector.multi_reduction <add>, %65, %cst_32 [1] : vector<8x8xf32> to vector<8xf32>
    %67 = vector.shape_cast %66 : vector<8xf32> to vector<8x1xf32>
    %68 = tpu.reciprocal %67 {approx = true} : vector<8x1xf32> -> vector<8x1xf32>
    %69 = vector.broadcast %68 : vector<8x1xf32> to vector<8x8xf32>
    %70 = arith.mulf %65, %69 : vector<8x8xf32>
    %71 = arith.truncf %70 : vector<8x8xf32> to vector<8x8xbf16>
    %cst_33 = arith.constant dense<0.000000e+00> : vector<8x8xf32>
    %72 = tpu.matmul %71, %55, %cst_33 {dimension_numbers = #tpu.dot_dimension_numbers<[1], [0], [0], [1], [0, 0, 1, 1], [], []>} : vector<8x8xbf16>, vector<8x8xbf16>, vector<8x8xf32> -> vector<8x8xf32>
    %73 = arith.truncf %72 : vector<8x8xf32> to vector<8x8xbf16>
    %c8 = arith.constant 8 : index
    %c0_34 = arith.constant 0 : index
    %74 = vector.load %arg8[%c8, %c0_34] : memref<32x32xbf16, #tpu.memory_space<vmem>>, vector<8x32xbf16>
    %cst_35 = arith.constant dense<0.000000e+00> : vector<8x32xf32>
    %75 = tpu.matmul %73, %74, %cst_35 {dimension_numbers = #tpu.dot_dimension_numbers<[1], [0], [0], [1], [0, 0, 1, 1], [], []>} : vector<8x8xbf16>, vector<8x32xbf16>, vector<8x32xf32> -> vector<8x32xf32>
    %76 = arith.addf %49, %75 : vector<8x32xf32>
    %77 = vector.extract_strided_slice %21 {offsets = [0, 16], sizes = [8, 8], strides = [1, 1]} : vector<8x32xf32> to vector<8x8xf32>
    %78 = arith.truncf %77 : vector<8x8xf32> to vector<8x8xbf16>
    %79 = vector.extract_strided_slice %18 {offsets = [0, 16], sizes = [8, 8], strides = [1, 1]} : vector<8x32xf32> to vector<8x8xf32>
    %80 = arith.truncf %79 : vector<8x8xf32> to vector<8x8xbf16>
    %81 = vector.extract_strided_slice %19 {offsets = [0, 16], sizes = [8, 8], strides = [1, 1]} : vector<8x32xf32> to vector<8x8xf32>
    %82 = arith.truncf %81 : vector<8x8xf32> to vector<8x8xbf16>
    %cst_36 = arith.constant dense<0.000000e+00> : vector<8x8xf32>
    %83 = tpu.matmul %78, %80, %cst_36 {dimension_numbers = #tpu.dot_dimension_numbers<[1], [1], [0], [0], [0, 0, 1, 0], [], []>} : vector<8x8xbf16>, vector<8x8xbf16>, vector<8x8xf32> -> vector<8x8xf32>
    %cst_37 = arith.constant 5.000000e-01 : f32
    %84 = vector.broadcast %cst_37 : f32 to vector<8x8xf32>
    %85 = arith.cmpf ogt, %5, %84 : vector<8x8xf32>
    %cst_38 = arith.constant -1.000000e+09 : f32
    %86 = vector.broadcast %cst_38 : f32 to vector<8x8xf32>
    %87 = arith.select %85, %83, %86 : vector<8x8xi1>, vector<8x8xf32>
    %cst_39 = arith.constant dense<0xFF800000> : vector<8xf32>
    %88 = vector.multi_reduction <maximumf>, %87, %cst_39 [1] : vector<8x8xf32> to vector<8xf32>
    %89 = vector.shape_cast %88 : vector<8xf32> to vector<8x1xf32>
    %90 = vector.broadcast %89 : vector<8x1xf32> to vector<8x8xf32>
    %91 = arith.subf %87, %90 : vector<8x8xf32>
    %92 = math.exp %91 : vector<8x8xf32>
    %cst_40 = arith.constant dense<0.000000e+00> : vector<8xf32>
    %93 = vector.multi_reduction <add>, %92, %cst_40 [1] : vector<8x8xf32> to vector<8xf32>
    %94 = vector.shape_cast %93 : vector<8xf32> to vector<8x1xf32>
    %95 = tpu.reciprocal %94 {approx = true} : vector<8x1xf32> -> vector<8x1xf32>
    %96 = vector.broadcast %95 : vector<8x1xf32> to vector<8x8xf32>
    %97 = arith.mulf %92, %96 : vector<8x8xf32>
    %98 = arith.truncf %97 : vector<8x8xf32> to vector<8x8xbf16>
    %cst_41 = arith.constant dense<0.000000e+00> : vector<8x8xf32>
    %99 = tpu.matmul %98, %82, %cst_41 {dimension_numbers = #tpu.dot_dimension_numbers<[1], [0], [0], [1], [0, 0, 1, 1], [], []>} : vector<8x8xbf16>, vector<8x8xbf16>, vector<8x8xf32> -> vector<8x8xf32>
    %100 = arith.truncf %99 : vector<8x8xf32> to vector<8x8xbf16>
    %c16 = arith.constant 16 : index
    %c0_42 = arith.constant 0 : index
    %101 = vector.load %arg8[%c16, %c0_42] : memref<32x32xbf16, #tpu.memory_space<vmem>>, vector<8x32xbf16>
    %cst_43 = arith.constant dense<0.000000e+00> : vector<8x32xf32>
    %102 = tpu.matmul %100, %101, %cst_43 {dimension_numbers = #tpu.dot_dimension_numbers<[1], [0], [0], [1], [0, 0, 1, 1], [], []>} : vector<8x8xbf16>, vector<8x32xbf16>, vector<8x32xf32> -> vector<8x32xf32>
    %103 = arith.addf %76, %102 : vector<8x32xf32>
    %104 = vector.extract_strided_slice %21 {offsets = [0, 24], sizes = [8, 8], strides = [1, 1]} : vector<8x32xf32> to vector<8x8xf32>
    %105 = arith.truncf %104 : vector<8x8xf32> to vector<8x8xbf16>
    %106 = vector.extract_strided_slice %18 {offsets = [0, 24], sizes = [8, 8], strides = [1, 1]} : vector<8x32xf32> to vector<8x8xf32>
    %107 = arith.truncf %106 : vector<8x8xf32> to vector<8x8xbf16>
    %108 = vector.extract_strided_slice %19 {offsets = [0, 24], sizes = [8, 8], strides = [1, 1]} : vector<8x32xf32> to vector<8x8xf32>
    %109 = arith.truncf %108 : vector<8x8xf32> to vector<8x8xbf16>
    %cst_44 = arith.constant dense<0.000000e+00> : vector<8x8xf32>
    %110 = tpu.matmul %105, %107, %cst_44 {dimension_numbers = #tpu.dot_dimension_numbers<[1], [1], [0], [0], [0, 0, 1, 0], [], []>} : vector<8x8xbf16>, vector<8x8xbf16>, vector<8x8xf32> -> vector<8x8xf32>
    %cst_45 = arith.constant 5.000000e-01 : f32
    %111 = vector.broadcast %cst_45 : f32 to vector<8x8xf32>
    %112 = arith.cmpf ogt, %5, %111 : vector<8x8xf32>
    %cst_46 = arith.constant -1.000000e+09 : f32
    %113 = vector.broadcast %cst_46 : f32 to vector<8x8xf32>
    %114 = arith.select %112, %110, %113 : vector<8x8xi1>, vector<8x8xf32>
    %cst_47 = arith.constant dense<0xFF800000> : vector<8xf32>
    %115 = vector.multi_reduction <maximumf>, %114, %cst_47 [1] : vector<8x8xf32> to vector<8xf32>
    %116 = vector.shape_cast %115 : vector<8xf32> to vector<8x1xf32>
    %117 = vector.broadcast %116 : vector<8x1xf32> to vector<8x8xf32>
    %118 = arith.subf %114, %117 : vector<8x8xf32>
    %119 = math.exp %118 : vector<8x8xf32>
    %cst_48 = arith.constant dense<0.000000e+00> : vector<8xf32>
    %120 = vector.multi_reduction <add>, %119, %cst_48 [1] : vector<8x8xf32> to vector<8xf32>
    %121 = vector.shape_cast %120 : vector<8xf32> to vector<8x1xf32>
    %122 = tpu.reciprocal %121 {approx = true} : vector<8x1xf32> -> vector<8x1xf32>
    %123 = vector.broadcast %122 : vector<8x1xf32> to vector<8x8xf32>
    %124 = arith.mulf %119, %123 : vector<8x8xf32>
    %125 = arith.truncf %124 : vector<8x8xf32> to vector<8x8xbf16>
    %cst_49 = arith.constant dense<0.000000e+00> : vector<8x8xf32>
    %126 = tpu.matmul %125, %109, %cst_49 {dimension_numbers = #tpu.dot_dimension_numbers<[1], [0], [0], [1], [0, 0, 1, 1], [], []>} : vector<8x8xbf16>, vector<8x8xbf16>, vector<8x8xf32> -> vector<8x8xf32>
    %127 = arith.truncf %126 : vector<8x8xf32> to vector<8x8xbf16>
    %c24 = arith.constant 24 : index
    %c0_50 = arith.constant 0 : index
    %128 = vector.load %arg8[%c24, %c0_50] : memref<32x32xbf16, #tpu.memory_space<vmem>>, vector<8x32xbf16>
    %cst_51 = arith.constant dense<0.000000e+00> : vector<8x32xf32>
    %129 = tpu.matmul %127, %128, %cst_51 {dimension_numbers = #tpu.dot_dimension_numbers<[1], [0], [0], [1], [0, 0, 1, 1], [], []>} : vector<8x8xbf16>, vector<8x32xbf16>, vector<8x32xf32> -> vector<8x32xf32>
    %130 = arith.addf %103, %129 : vector<8x32xf32>
    %c0_52 = arith.constant 0 : index
    %c0_53 = arith.constant 0 : index
    %131 = vector.load %arg9[%c0_52, %c0_53] : memref<1x32xf32, #tpu.memory_space<vmem>>, vector<1x32xf32>
    %132 = vector.broadcast %131 : vector<1x32xf32> to vector<8x32xf32>
    %133 = arith.addf %130, %132 : vector<8x32xf32>
    %134 = arith.addf %1, %133 : vector<8x32xf32>
    %cst_54 = arith.constant dense<0.000000e+00> : vector<8xf32>
    %135 = vector.multi_reduction <add>, %134, %cst_54 [1] : vector<8x32xf32> to vector<8xf32>
    %136 = vector.shape_cast %135 : vector<8xf32> to vector<8x1xf32>
    %cst_55 = arith.constant 3.200000e+01 : f32
    %137 = vector.broadcast %cst_55 : f32 to vector<8x1xf32>
    %138 = arith.divf %136, %137 : vector<8x1xf32>
    %139 = vector.broadcast %138 : vector<8x1xf32> to vector<8x32xf32>
    %140 = arith.subf %134, %139 : vector<8x32xf32>
    %141 = arith.mulf %140, %140 : vector<8x32xf32>
    %cst_56 = arith.constant dense<0.000000e+00> : vector<8xf32>
    %142 = vector.multi_reduction <add>, %141, %cst_56 [1] : vector<8x32xf32> to vector<8xf32>
    %143 = vector.shape_cast %142 : vector<8xf32> to vector<8x1xf32>
    %cst_57 = arith.constant 3.200000e+01 : f32
    %144 = vector.broadcast %cst_57 : f32 to vector<8x1xf32>
    %145 = arith.divf %143, %144 : vector<8x1xf32>
    %146 = vector.broadcast %138 : vector<8x1xf32> to vector<8x32xf32>
    %147 = arith.subf %134, %146 : vector<8x32xf32>
    %cst_58 = arith.constant 9.99999974E-6 : f32
    %148 = vector.broadcast %cst_58 : f32 to vector<8x1xf32>
    %149 = arith.addf %145, %148 : vector<8x1xf32>
    %150 = math.rsqrt %149 : vector<8x1xf32>
    %151 = vector.broadcast %150 : vector<8x1xf32> to vector<8x32xf32>
    %152 = arith.mulf %147, %151 : vector<8x32xf32>
    %c0_59 = arith.constant 0 : index
    %c0_60 = arith.constant 0 : index
    %153 = vector.load %arg10[%c0_59, %c0_60] : memref<1x32xf32, #tpu.memory_space<vmem>>, vector<1x32xf32>
    %154 = vector.broadcast %153 : vector<1x32xf32> to vector<8x32xf32>
    %155 = arith.mulf %152, %154 : vector<8x32xf32>
    %c0_61 = arith.constant 0 : index
    %c0_62 = arith.constant 0 : index
    %156 = vector.load %arg11[%c0_61, %c0_62] : memref<1x32xf32, #tpu.memory_space<vmem>>, vector<1x32xf32>
    %157 = vector.broadcast %156 : vector<1x32xf32> to vector<8x32xf32>
    %158 = arith.addf %155, %157 : vector<8x32xf32>
    %c0_63 = arith.constant 0 : index
    %c0_64 = arith.constant 0 : index
    %c0_65 = arith.constant 0 : index
    %159 = vector.load %arg12[%c0_63, %c0_64, %c0_65] : memref<1x8x32xf32, #tpu.memory_space<vmem>>, vector<1x8x32xf32>
    %160 = vector.shape_cast %159 : vector<1x8x32xf32> to vector<8x32xf32>
    %161 = vector.shape_cast %158 : vector<8x32xf32> to vector<1x8x32xf32>
    tpu.vector_store %arg12[%c0_63, %c0_64, %c0_65], %161 {strides = array<i32>} : memref<1x8x32xf32, #tpu.memory_space<vmem>>, vector<1x8x32xf32>,
    return
  }
  func.func @transform_0(%arg0: i32) -> (i32, i32, i32) {
    %c0_i32 = arith.constant 0 : i32
    %c0_i32_0 = arith.constant 0 : i32
    %c0_i32_1 = arith.constant 0 : i32
    return %arg0, %c0_i32, %c0_i32_0 : i32, i32, i32
  }
  func.func @transform_1(%arg0: i32) -> (i32, i32, i32) {
    %c0_i32 = arith.constant 0 : i32
    %c0_i32_0 = arith.constant 0 : i32
    %c0_i32_1 = arith.constant 0 : i32
    return %arg0, %c0_i32, %c0_i32_0 : i32, i32, i32
  }
  func.func @transform_2(%arg0: i32) -> (i32, i32, i32) {
    %c0_i32 = arith.constant 0 : i32
    %c0_i32_0 = arith.constant 0 : i32
    %c0_i32_1 = arith.constant 0 : i32
    return %arg0, %c0_i32, %c0_i32_0 : i32, i32, i32
  }
  func.func @transform_3(%arg0: i32) -> (i32, i32) {
    %c0_i32 = arith.constant 0 : i32
    %c0_i32_0 = arith.constant 0 : i32
    %c0_i32_1 = arith.constant 0 : i32
    return %c0_i32, %c0_i32_0 : i32, i32
  }
  func.func @transform_4(%arg0: i32) -> (i32, i32) {
    %c0_i32 = arith.constant 0 : i32
    %c0_i32_0 = arith.constant 0 : i32
    %c0_i32_1 = arith.constant 0 : i32
    return %c0_i32, %c0_i32_0 : i32, i32
  }
  func.func @transform_5(%arg0: i32) -> (i32, i32) {
    %c0_i32 = arith.constant 0 : i32
    %c0_i32_0 = arith.constant 0 : i32
    %c0_i32_1 = arith.constant 0 : i32
    return %c0_i32, %c0_i32_0 : i32, i32
  }
  func.func @transform_6(%arg0: i32) -> (i32, i32) {
    %c0_i32 = arith.constant 0 : i32
    %c0_i32_0 = arith.constant 0 : i32
    %c0_i32_1 = arith.constant 0 : i32
    return %c0_i32, %c0_i32_0 : i32, i32
  }
  func.func @transform_7(%arg0: i32) -> (i32, i32) {
    %c0_i32 = arith.constant 0 : i32
    %c0_i32_0 = arith.constant 0 : i32
    %c0_i32_1 = arith.constant 0 : i32
    return %c0_i32, %c0_i32_0 : i32, i32
  }
  func.func @transform_8(%arg0: i32) -> (i32, i32) {
    %c0_i32 = arith.constant 0 : i32
    %c0_i32_0 = arith.constant 0 : i32
    %c0_i32_1 = arith.constant 0 : i32
    return %c0_i32, %c0_i32_0 : i32, i32
  }
  func.func @transform_9(%arg0: i32) -> (i32, i32) {
    %c0_i32 = arith.constant 0 : i32
    %c0_i32_0 = arith.constant 0 : i32
    %c0_i32_1 = arith.constant 0 : i32
    return %c0_i32, %c0_i32_0 : i32, i32
  }
  func.func @transform_10(%arg0: i32) -> (i32, i32) {
    %c0_i32 = arith.constant 0 : i32
    %c0_i32_0 = arith.constant 0 : i32
    %c0_i32_1 = arith.constant 0 : i32
    return %c0_i32, %c0_i32_0 : i32, i32
  }
  func.func @transform_11(%arg0: i32) -> (i32, i32, i32) {
    %c0_i32 = arith.constant 0 : i32
    %c0_i32_0 = arith.constant 0 : i32
    %c0_i32_1 = arith.constant 0 : i32
    return %arg0, %c0_i32, %c0_i32_0 : i32, i32, i32
  }
}

module attributes {stable_mosaic.version = 11 : i64} {
  func.func @_mha_ln_kernel(%arg0: i32, %arg1: memref<1x8x32xf32, #tpu.memory_space<vmem>>, %arg2: memref<1x8x32xf32, #tpu.memory_space<vmem>>, %arg3: memref<1x1x8xf32, #tpu.memory_space<vmem>>, %arg4: memref<32x32xbf16, #tpu.memory_space<vmem>>, %arg5: memref<1x32xf32, #tpu.memory_space<vmem>>, %arg6: memref<32x64xbf16, #tpu.memory_space<vmem>>, %arg7: memref<1x64xf32, #tpu.memory_space<vmem>>, %arg8: memref<32x32xbf16, #tpu.memory_space<vmem>>, %arg9: memref<1x32xf32, #tpu.memory_space<vmem>>, %arg10: memref<1x32xf32, #tpu.memory_space<vmem>>, %arg11: memref<1x32xf32, #tpu.memory_space<vmem>>, %arg12: memref<1x8x32xf32, #tpu.memory_space<vmem>>) attributes {dimension_semantics = [#tpu.dimension_semantics<parallel>], iteration_bounds = array<i64: 2>, scalar_prefetch = 0 : i64, scratch_operands = 0 : i64, tpu.core_type = #tpu.core_type<tc>, window_params = [{transform_indices = @transform_0, window_bounds = array<i64: 1, 8, 32>}, {transform_indices = @transform_1, window_bounds = array<i64: 1, 8, 32>}, {transform_indices = @transform_2, window_bounds = array<i64: 1, 1, 8>}, {pipeline_mode = #tpu.pipeline_mode<synchronous>, transform_indices = @transform_3, window_bounds = array<i64: 32, 32>}, {pipeline_mode = #tpu.pipeline_mode<synchronous>, transform_indices = @transform_4, window_bounds = array<i64: 1, 32>}, {pipeline_mode = #tpu.pipeline_mode<synchronous>, transform_indices = @transform_5, window_bounds = array<i64: 32, 64>}, {pipeline_mode = #tpu.pipeline_mode<synchronous>, transform_indices = @transform_6, window_bounds = array<i64: 1, 64>}, {pipeline_mode = #tpu.pipeline_mode<synchronous>, transform_indices = @transform_7, window_bounds = array<i64: 32, 32>}, {pipeline_mode = #tpu.pipeline_mode<synchronous>, transform_indices = @transform_8, window_bounds = array<i64: 1, 32>}, {pipeline_mode = #tpu.pipeline_mode<synchronous>, transform_indices = @transform_9, window_bounds = array<i64: 1, 32>}, {pipeline_mode = #tpu.pipeline_mode<synchronous>, transform_indices = @transform_10, window_bounds = array<i64: 1, 32>}, {transform_indices = @transform_11, window_bounds = array<i64: 1, 8, 32>}]} {
    %c0 = arith.constant 0 : index
    %c0_0 = arith.constant 0 : index
    %c0_1 = arith.constant 0 : index
    %0 = vector.load %arg1[%c0, %c0_0, %c0_1] : memref<1x8x32xf32, #tpu.memory_space<vmem>>, vector<1x8x32xf32>
    %1 = vector.shape_cast %0 : vector<1x8x32xf32> to vector<8x32xf32>
    %c0_2 = arith.constant 0 : index
    %c0_3 = arith.constant 0 : index
    %c0_4 = arith.constant 0 : index
    %2 = vector.load %arg2[%c0_2, %c0_3, %c0_4] : memref<1x8x32xf32, #tpu.memory_space<vmem>>, vector<1x8x32xf32>
    %3 = vector.shape_cast %2 : vector<1x8x32xf32> to vector<8x32xf32>
    %c0_5 = arith.constant 0 : index
    %c0_6 = arith.constant 0 : index
    %c0_7 = arith.constant 0 : index
    %4 = vector.load %arg3[%c0_5, %c0_6, %c0_7] : memref<1x1x8xf32, #tpu.memory_space<vmem>>, vector<1x1x8xf32>
    %5 = vector.shape_cast %4 : vector<1x1x8xf32> to vector<1x8xf32>
    %6 = arith.truncf %1 : vector<8x32xf32> to vector<8x32xbf16>
    %c0_8 = arith.constant 0 : index
    %c0_9 = arith.constant 0 : index
    %7 = vector.load %arg4[%c0_8, %c0_9] : memref<32x32xbf16, #tpu.memory_space<vmem>>, vector<32x32xbf16>
    %cst = arith.constant dense<0.000000e+00> : vector<8x32xf32>
    %8 = tpu.matmul %6, %7, %cst {dimension_numbers = #tpu.dot_dimension_numbers<[1], [0], [0], [1], [0, 0, 1, 1], [], []>} : vector<8x32xbf16>, vector<32x32xbf16>, vector<8x32xf32> -> vector<8x32xf32>
    %c0_10 = arith.constant 0 : index
    %c0_11 = arith.constant 0 : index
    %9 = vector.load %arg5[%c0_10, %c0_11] : memref<1x32xf32, #tpu.memory_space<vmem>>, vector<1x32xf32>
    %10 = vector.broadcast %9 : vector<1x32xf32> to vector<8x32xf32>
    %11 = arith.addf %8, %10 : vector<8x32xf32>
    %12 = arith.truncf %3 : vector<8x32xf32> to vector<8x32xbf16>
    %c0_12 = arith.constant 0 : index
    %c0_13 = arith.constant 0 : index
    %13 = vector.load %arg6[%c0_12, %c0_13] : memref<32x64xbf16, #tpu.memory_space<vmem>>, vector<32x64xbf16>
    %cst_14 = arith.constant dense<0.000000e+00> : vector<8x64xf32>
    %14 = tpu.matmul %12, %13, %cst_14 {dimension_numbers = #tpu.dot_dimension_numbers<[1], [0], [0], [1], [0, 0, 1, 1], [], []>} : vector<8x32xbf16>, vector<32x64xbf16>, vector<8x64xf32> -> vector<8x64xf32>
    %c0_15 = arith.constant 0 : index
    %c0_16 = arith.constant 0 : index
    %15 = vector.load %arg7[%c0_15, %c0_16] : memref<1x64xf32, #tpu.memory_space<vmem>>, vector<1x64xf32>
    %16 = vector.broadcast %15 : vector<1x64xf32> to vector<8x64xf32>
    %17 = arith.addf %14, %16 : vector<8x64xf32>
    %18 = vector.extract_strided_slice %17 {offsets = [0, 0], sizes = [8, 32], strides = [1, 1]} : vector<8x64xf32> to vector<8x32xf32>
    %19 = vector.extract_strided_slice %17 {offsets = [0, 32], sizes = [8, 32], strides = [1, 1]} : vector<8x64xf32> to vector<8x32xf32>
    %cst_17 = arith.constant 0.353553385 : f32
    %20 = vector.broadcast %cst_17 : f32 to vector<8x32xf32>
    %21 = arith.mulf %11, %20 : vector<8x32xf32>
    %cst_18 = arith.constant 0.000000e+00 : f32
    %22 = vector.broadcast %cst_18 : f32 to vector<8x32xf32>
    %23 = vector.extract_strided_slice %21 {offsets = [0, 0], sizes = [8, 8], strides = [1, 1]} : vector<8x32xf32> to vector<8x8xf32>
    %24 = arith.truncf %23 : vector<8x8xf32> to vector<8x8xbf16>
    %25 = vector.extract_strided_slice %18 {offsets = [0, 0], sizes = [8, 8], strides = [1, 1]} : vector<8x32xf32> to vector<8x8xf32>
    %26 = arith.truncf %25 : vector<8x8xf32> to vector<8x8xbf16>
    %27 = vector.extract_strided_slice %19 {offsets = [0, 0], sizes = [8, 8], strides = [1, 1]} : vector<8x32xf32> to vector<8x8xf32>
    %28 = arith.truncf %27 : vector<8x8xf32> to vector<8x8xbf16>
    %cst_19 = arith.constant dense<0.000000e+00> : vector<8x8xf32>
    %29 = tpu.matmul %24, %26, %cst_19 {dimension_numbers = #tpu.dot_dimension_numbers<[1], [1], [0], [0], [0, 0, 1, 0], [], []>} : vector<8x8xbf16>, vector<8x8xbf16>, vector<8x8xf32> -> vector<8x8xf32>
    %cst_20 = arith.constant 5.000000e-01 : f32
    %30 = vector.broadcast %cst_20 : f32 to vector<1x8xf32>
    %31 = arith.cmpf ogt, %5, %30 : vector<1x8xf32>
    %cst_21 = arith.constant -1.000000e+09 : f32
    %32 = vector.shape_cast %31 : vector<1x8xi1> to vector<1x8xi1>
    %33 = vector.broadcast %32 : vector<1x8xi1> to vector<8x8xi1>
    %34 = vector.broadcast %cst_21 : f32 to vector<8x8xf32>
    %35 = arith.select %33, %29, %34 : vector<8x8xi1>, vector<8x8xf32>
    %cst_22 = arith.constant dense<0xFF800000> : vector<8xf32>
    %36 = vector.multi_reduction <maximumf>, %35, %cst_22 [1] : vector<8x8xf32> to vector<8xf32>
    %37 = vector.shape_cast %36 : vector<8xf32> to vector<8x1xf32>
    %38 = vector.broadcast %37 : vector<8x1xf32> to vector<8x8xf32>
    %39 = arith.subf %35, %38 : vector<8x8xf32>
    %40 = math.exp %39 : vector<8x8xf32>
    %cst_23 = arith.constant dense<0.000000e+00> : vector<8xf32>
    %41 = vector.multi_reduction <add>, %40, %cst_23 [1] : vector<8x8xf32> to vector<8xf32>
    %42 = vector.shape_cast %41 : vector<8xf32> to vector<8x1xf32>
    %43 = tpu.reciprocal %42 {approx = true} : vector<8x1xf32> -> vector<8x1xf32>
    %44 = vector.broadcast %43 : vector<8x1xf32> to vector<8x8xf32>
    %45 = arith.mulf %40, %44 : vector<8x8xf32>
    %46 = arith.truncf %45 : vector<8x8xf32> to vector<8x8xbf16>
    %cst_24 = arith.constant dense<0.000000e+00> : vector<8x8xf32>
    %47 = tpu.matmul %46, %28, %cst_24 {dimension_numbers = #tpu.dot_dimension_numbers<[1], [0], [0], [1], [0, 0, 1, 1], [], []>} : vector<8x8xbf16>, vector<8x8xbf16>, vector<8x8xf32> -> vector<8x8xf32>
    %48 = arith.truncf %47 : vector<8x8xf32> to vector<8x8xbf16>
    %c0_25 = arith.constant 0 : index
    %c0_26 = arith.constant 0 : index
    %49 = vector.load %arg8[%c0_25, %c0_26] : memref<32x32xbf16, #tpu.memory_space<vmem>>, vector<8x32xbf16>
    %cst_27 = arith.constant dense<0.000000e+00> : vector<8x32xf32>
    %50 = tpu.matmul %48, %49, %cst_27 {dimension_numbers = #tpu.dot_dimension_numbers<[1], [0], [0], [1], [0, 0, 1, 1], [], []>} : vector<8x8xbf16>, vector<8x32xbf16>, vector<8x32xf32> -> vector<8x32xf32>
    %51 = arith.addf %22, %50 : vector<8x32xf32>
    %52 = vector.extract_strided_slice %21 {offsets = [0, 8], sizes = [8, 8], strides = [1, 1]} : vector<8x32xf32> to vector<8x8xf32>
    %53 = arith.truncf %52 : vector<8x8xf32> to vector<8x8xbf16>
    %54 = vector.extract_strided_slice %18 {offsets = [0, 8], sizes = [8, 8], strides = [1, 1]} : vector<8x32xf32> to vector<8x8xf32>
    %55 = arith.truncf %54 : vector<8x8xf32> to vector<8x8xbf16>
    %56 = vector.extract_strided_slice %19 {offsets = [0, 8], sizes = [8, 8], strides = [1, 1]} : vector<8x32xf32> to vector<8x8xf32>
    %57 = arith.truncf %56 : vector<8x8xf32> to vector<8x8xbf16>
    %cst_28 = arith.constant dense<0.000000e+00> : vector<8x8xf32>
    %58 = tpu.matmul %53, %55, %cst_28 {dimension_numbers = #tpu.dot_dimension_numbers<[1], [1], [0], [0], [0, 0, 1, 0], [], []>} : vector<8x8xbf16>, vector<8x8xbf16>, vector<8x8xf32> -> vector<8x8xf32>
    %cst_29 = arith.constant 5.000000e-01 : f32
    %59 = vector.broadcast %cst_29 : f32 to vector<1x8xf32>
    %60 = arith.cmpf ogt, %5, %59 : vector<1x8xf32>
    %cst_30 = arith.constant -1.000000e+09 : f32
    %61 = vector.shape_cast %60 : vector<1x8xi1> to vector<1x8xi1>
    %62 = vector.broadcast %61 : vector<1x8xi1> to vector<8x8xi1>
    %63 = vector.broadcast %cst_30 : f32 to vector<8x8xf32>
    %64 = arith.select %62, %58, %63 : vector<8x8xi1>, vector<8x8xf32>
    %cst_31 = arith.constant dense<0xFF800000> : vector<8xf32>
    %65 = vector.multi_reduction <maximumf>, %64, %cst_31 [1] : vector<8x8xf32> to vector<8xf32>
    %66 = vector.shape_cast %65 : vector<8xf32> to vector<8x1xf32>
    %67 = vector.broadcast %66 : vector<8x1xf32> to vector<8x8xf32>
    %68 = arith.subf %64, %67 : vector<8x8xf32>
    %69 = math.exp %68 : vector<8x8xf32>
    %cst_32 = arith.constant dense<0.000000e+00> : vector<8xf32>
    %70 = vector.multi_reduction <add>, %69, %cst_32 [1] : vector<8x8xf32> to vector<8xf32>
    %71 = vector.shape_cast %70 : vector<8xf32> to vector<8x1xf32>
    %72 = tpu.reciprocal %71 {approx = true} : vector<8x1xf32> -> vector<8x1xf32>
    %73 = vector.broadcast %72 : vector<8x1xf32> to vector<8x8xf32>
    %74 = arith.mulf %69, %73 : vector<8x8xf32>
    %75 = arith.truncf %74 : vector<8x8xf32> to vector<8x8xbf16>
    %cst_33 = arith.constant dense<0.000000e+00> : vector<8x8xf32>
    %76 = tpu.matmul %75, %57, %cst_33 {dimension_numbers = #tpu.dot_dimension_numbers<[1], [0], [0], [1], [0, 0, 1, 1], [], []>} : vector<8x8xbf16>, vector<8x8xbf16>, vector<8x8xf32> -> vector<8x8xf32>
    %77 = arith.truncf %76 : vector<8x8xf32> to vector<8x8xbf16>
    %c8 = arith.constant 8 : index
    %c0_34 = arith.constant 0 : index
    %78 = vector.load %arg8[%c8, %c0_34] : memref<32x32xbf16, #tpu.memory_space<vmem>>, vector<8x32xbf16>
    %cst_35 = arith.constant dense<0.000000e+00> : vector<8x32xf32>
    %79 = tpu.matmul %77, %78, %cst_35 {dimension_numbers = #tpu.dot_dimension_numbers<[1], [0], [0], [1], [0, 0, 1, 1], [], []>} : vector<8x8xbf16>, vector<8x32xbf16>, vector<8x32xf32> -> vector<8x32xf32>
    %80 = arith.addf %51, %79 : vector<8x32xf32>
    %81 = vector.extract_strided_slice %21 {offsets = [0, 16], sizes = [8, 8], strides = [1, 1]} : vector<8x32xf32> to vector<8x8xf32>
    %82 = arith.truncf %81 : vector<8x8xf32> to vector<8x8xbf16>
    %83 = vector.extract_strided_slice %18 {offsets = [0, 16], sizes = [8, 8], strides = [1, 1]} : vector<8x32xf32> to vector<8x8xf32>
    %84 = arith.truncf %83 : vector<8x8xf32> to vector<8x8xbf16>
    %85 = vector.extract_strided_slice %19 {offsets = [0, 16], sizes = [8, 8], strides = [1, 1]} : vector<8x32xf32> to vector<8x8xf32>
    %86 = arith.truncf %85 : vector<8x8xf32> to vector<8x8xbf16>
    %cst_36 = arith.constant dense<0.000000e+00> : vector<8x8xf32>
    %87 = tpu.matmul %82, %84, %cst_36 {dimension_numbers = #tpu.dot_dimension_numbers<[1], [1], [0], [0], [0, 0, 1, 0], [], []>} : vector<8x8xbf16>, vector<8x8xbf16>, vector<8x8xf32> -> vector<8x8xf32>
    %cst_37 = arith.constant 5.000000e-01 : f32
    %88 = vector.broadcast %cst_37 : f32 to vector<1x8xf32>
    %89 = arith.cmpf ogt, %5, %88 : vector<1x8xf32>
    %cst_38 = arith.constant -1.000000e+09 : f32
    %90 = vector.shape_cast %89 : vector<1x8xi1> to vector<1x8xi1>
    %91 = vector.broadcast %90 : vector<1x8xi1> to vector<8x8xi1>
    %92 = vector.broadcast %cst_38 : f32 to vector<8x8xf32>
    %93 = arith.select %91, %87, %92 : vector<8x8xi1>, vector<8x8xf32>
    %cst_39 = arith.constant dense<0xFF800000> : vector<8xf32>
    %94 = vector.multi_reduction <maximumf>, %93, %cst_39 [1] : vector<8x8xf32> to vector<8xf32>
    %95 = vector.shape_cast %94 : vector<8xf32> to vector<8x1xf32>
    %96 = vector.broadcast %95 : vector<8x1xf32> to vector<8x8xf32>
    %97 = arith.subf %93, %96 : vector<8x8xf32>
    %98 = math.exp %97 : vector<8x8xf32>
    %cst_40 = arith.constant dense<0.000000e+00> : vector<8xf32>
    %99 = vector.multi_reduction <add>, %98, %cst_40 [1] : vector<8x8xf32> to vector<8xf32>
    %100 = vector.shape_cast %99 : vector<8xf32> to vector<8x1xf32>
    %101 = tpu.reciprocal %100 {approx = true} : vector<8x1xf32> -> vector<8x1xf32>
    %102 = vector.broadcast %101 : vector<8x1xf32> to vector<8x8xf32>
    %103 = arith.mulf %98, %102 : vector<8x8xf32>
    %104 = arith.truncf %103 : vector<8x8xf32> to vector<8x8xbf16>
    %cst_41 = arith.constant dense<0.000000e+00> : vector<8x8xf32>
    %105 = tpu.matmul %104, %86, %cst_41 {dimension_numbers = #tpu.dot_dimension_numbers<[1], [0], [0], [1], [0, 0, 1, 1], [], []>} : vector<8x8xbf16>, vector<8x8xbf16>, vector<8x8xf32> -> vector<8x8xf32>
    %106 = arith.truncf %105 : vector<8x8xf32> to vector<8x8xbf16>
    %c16 = arith.constant 16 : index
    %c0_42 = arith.constant 0 : index
    %107 = vector.load %arg8[%c16, %c0_42] : memref<32x32xbf16, #tpu.memory_space<vmem>>, vector<8x32xbf16>
    %cst_43 = arith.constant dense<0.000000e+00> : vector<8x32xf32>
    %108 = tpu.matmul %106, %107, %cst_43 {dimension_numbers = #tpu.dot_dimension_numbers<[1], [0], [0], [1], [0, 0, 1, 1], [], []>} : vector<8x8xbf16>, vector<8x32xbf16>, vector<8x32xf32> -> vector<8x32xf32>
    %109 = arith.addf %80, %108 : vector<8x32xf32>
    %110 = vector.extract_strided_slice %21 {offsets = [0, 24], sizes = [8, 8], strides = [1, 1]} : vector<8x32xf32> to vector<8x8xf32>
    %111 = arith.truncf %110 : vector<8x8xf32> to vector<8x8xbf16>
    %112 = vector.extract_strided_slice %18 {offsets = [0, 24], sizes = [8, 8], strides = [1, 1]} : vector<8x32xf32> to vector<8x8xf32>
    %113 = arith.truncf %112 : vector<8x8xf32> to vector<8x8xbf16>
    %114 = vector.extract_strided_slice %19 {offsets = [0, 24], sizes = [8, 8], strides = [1, 1]} : vector<8x32xf32> to vector<8x8xf32>
    %115 = arith.truncf %114 : vector<8x8xf32> to vector<8x8xbf16>
    %cst_44 = arith.constant dense<0.000000e+00> : vector<8x8xf32>
    %116 = tpu.matmul %111, %113, %cst_44 {dimension_numbers = #tpu.dot_dimension_numbers<[1], [1], [0], [0], [0, 0, 1, 0], [], []>} : vector<8x8xbf16>, vector<8x8xbf16>, vector<8x8xf32> -> vector<8x8xf32>
    %cst_45 = arith.constant 5.000000e-01 : f32
    %117 = vector.broadcast %cst_45 : f32 to vector<1x8xf32>
    %118 = arith.cmpf ogt, %5, %117 : vector<1x8xf32>
    %cst_46 = arith.constant -1.000000e+09 : f32
    %119 = vector.shape_cast %118 : vector<1x8xi1> to vector<1x8xi1>
    %120 = vector.broadcast %119 : vector<1x8xi1> to vector<8x8xi1>
    %121 = vector.broadcast %cst_46 : f32 to vector<8x8xf32>
    %122 = arith.select %120, %116, %121 : vector<8x8xi1>, vector<8x8xf32>
    %cst_47 = arith.constant dense<0xFF800000> : vector<8xf32>
    %123 = vector.multi_reduction <maximumf>, %122, %cst_47 [1] : vector<8x8xf32> to vector<8xf32>
    %124 = vector.shape_cast %123 : vector<8xf32> to vector<8x1xf32>
    %125 = vector.broadcast %124 : vector<8x1xf32> to vector<8x8xf32>
    %126 = arith.subf %122, %125 : vector<8x8xf32>
    %127 = math.exp %126 : vector<8x8xf32>
    %cst_48 = arith.constant dense<0.000000e+00> : vector<8xf32>
    %128 = vector.multi_reduction <add>, %127, %cst_48 [1] : vector<8x8xf32> to vector<8xf32>
    %129 = vector.shape_cast %128 : vector<8xf32> to vector<8x1xf32>
    %130 = tpu.reciprocal %129 {approx = true} : vector<8x1xf32> -> vector<8x1xf32>
    %131 = vector.broadcast %130 : vector<8x1xf32> to vector<8x8xf32>
    %132 = arith.mulf %127, %131 : vector<8x8xf32>
    %133 = arith.truncf %132 : vector<8x8xf32> to vector<8x8xbf16>
    %cst_49 = arith.constant dense<0.000000e+00> : vector<8x8xf32>
    %134 = tpu.matmul %133, %115, %cst_49 {dimension_numbers = #tpu.dot_dimension_numbers<[1], [0], [0], [1], [0, 0, 1, 1], [], []>} : vector<8x8xbf16>, vector<8x8xbf16>, vector<8x8xf32> -> vector<8x8xf32>
    %135 = arith.truncf %134 : vector<8x8xf32> to vector<8x8xbf16>
    %c24 = arith.constant 24 : index
    %c0_50 = arith.constant 0 : index
    %136 = vector.load %arg8[%c24, %c0_50] : memref<32x32xbf16, #tpu.memory_space<vmem>>, vector<8x32xbf16>
    %cst_51 = arith.constant dense<0.000000e+00> : vector<8x32xf32>
    %137 = tpu.matmul %135, %136, %cst_51 {dimension_numbers = #tpu.dot_dimension_numbers<[1], [0], [0], [1], [0, 0, 1, 1], [], []>} : vector<8x8xbf16>, vector<8x32xbf16>, vector<8x32xf32> -> vector<8x32xf32>
    %138 = arith.addf %109, %137 : vector<8x32xf32>
    %c0_52 = arith.constant 0 : index
    %c0_53 = arith.constant 0 : index
    %139 = vector.load %arg9[%c0_52, %c0_53] : memref<1x32xf32, #tpu.memory_space<vmem>>, vector<1x32xf32>
    %140 = vector.broadcast %139 : vector<1x32xf32> to vector<8x32xf32>
    %141 = arith.addf %138, %140 : vector<8x32xf32>
    %142 = arith.addf %1, %141 : vector<8x32xf32>
    %cst_54 = arith.constant dense<0.000000e+00> : vector<8xf32>
    %143 = vector.multi_reduction <add>, %142, %cst_54 [1] : vector<8x32xf32> to vector<8xf32>
    %144 = vector.shape_cast %143 : vector<8xf32> to vector<8x1xf32>
    %cst_55 = arith.constant 3.200000e+01 : f32
    %145 = vector.broadcast %cst_55 : f32 to vector<8x1xf32>
    %146 = arith.divf %144, %145 : vector<8x1xf32>
    %147 = vector.broadcast %146 : vector<8x1xf32> to vector<8x32xf32>
    %148 = arith.subf %142, %147 : vector<8x32xf32>
    %149 = arith.mulf %148, %148 : vector<8x32xf32>
    %cst_56 = arith.constant dense<0.000000e+00> : vector<8xf32>
    %150 = vector.multi_reduction <add>, %149, %cst_56 [1] : vector<8x32xf32> to vector<8xf32>
    %151 = vector.shape_cast %150 : vector<8xf32> to vector<8x1xf32>
    %cst_57 = arith.constant 3.200000e+01 : f32
    %152 = vector.broadcast %cst_57 : f32 to vector<8x1xf32>
    %153 = arith.divf %151, %152 : vector<8x1xf32>
    %154 = vector.broadcast %146 : vector<8x1xf32> to vector<8x32xf32>
    %155 = arith.subf %142, %154 : vector<8x32xf32>
    %cst_58 = arith.constant 9.99999974E-6 : f32
    %156 = vector.broadcast %cst_58 : f32 to vector<8x1xf32>
    %157 = arith.addf %153, %156 : vector<8x1xf32>
    %158 = math.rsqrt %157 : vector<8x1xf32>
    %159 = vector.broadcast %158 : vector<8x1xf32> to vector<8x32xf32>
    %160 = arith.mulf %155, %159 : vector<8x32xf32>
    %c0_59 = arith.constant 0 : index
    %c0_60 = arith.constant 0 : index
    %161 = vector.load %arg10[%c0_59, %c0_60] : memref<1x32xf32, #tpu.memory_space<vmem>>, vector<1x32xf32>
    %162 = vector.broadcast %161 : vector<1x32xf32> to vector<8x32xf32>
    %163 = arith.mulf %160, %162 : vector<8x32xf32>
    %c0_61 = arith.constant 0 : index
    %c0_62 = arith.constant 0 : index
    %164 = vector.load %arg11[%c0_61, %c0_62] : memref<1x32xf32, #tpu.memory_space<vmem>>, vector<1x32xf32>
    %165 = vector.broadcast %164 : vector<1x32xf32> to vector<8x32xf32>
    %166 = arith.addf %163, %165 : vector<8x32xf32>
    %c0_63 = arith.constant 0 : index
    %c0_64 = arith.constant 0 : index
    %c0_65 = arith.constant 0 : index
    %167 = vector.load %arg12[%c0_63, %c0_64, %c0_65] : memref<1x8x32xf32, #tpu.memory_space<vmem>>, vector<1x8x32xf32>
    %168 = vector.shape_cast %167 : vector<1x8x32xf32> to vector<8x32xf32>
    %169 = vector.shape_cast %166 : vector<8x32xf32> to vector<1x8x32xf32>
    tpu.vector_store %arg12[%c0_63, %c0_64, %c0_65], %169 {strides = array<i32>} : memref<1x8x32xf32, #tpu.memory_space<vmem>>, vector<1x8x32xf32>,
    return
  }
  func.func @transform_0(%arg0: i32) -> (i32, i32, i32) {
    %c0_i32 = arith.constant 0 : i32
    %c0_i32_0 = arith.constant 0 : i32
    %c0_i32_1 = arith.constant 0 : i32
    return %arg0, %c0_i32, %c0_i32_0 : i32, i32, i32
  }
  func.func @transform_1(%arg0: i32) -> (i32, i32, i32) {
    %c0_i32 = arith.constant 0 : i32
    %c0_i32_0 = arith.constant 0 : i32
    %c0_i32_1 = arith.constant 0 : i32
    return %arg0, %c0_i32, %c0_i32_0 : i32, i32, i32
  }
  func.func @transform_2(%arg0: i32) -> (i32, i32, i32) {
    %c0_i32 = arith.constant 0 : i32
    %c0_i32_0 = arith.constant 0 : i32
    %c0_i32_1 = arith.constant 0 : i32
    return %arg0, %c0_i32, %c0_i32_0 : i32, i32, i32
  }
  func.func @transform_3(%arg0: i32) -> (i32, i32) {
    %c0_i32 = arith.constant 0 : i32
    %c0_i32_0 = arith.constant 0 : i32
    %c0_i32_1 = arith.constant 0 : i32
    return %c0_i32, %c0_i32_0 : i32, i32
  }
  func.func @transform_4(%arg0: i32) -> (i32, i32) {
    %c0_i32 = arith.constant 0 : i32
    %c0_i32_0 = arith.constant 0 : i32
    %c0_i32_1 = arith.constant 0 : i32
    return %c0_i32, %c0_i32_0 : i32, i32
  }
  func.func @transform_5(%arg0: i32) -> (i32, i32) {
    %c0_i32 = arith.constant 0 : i32
    %c0_i32_0 = arith.constant 0 : i32
    %c0_i32_1 = arith.constant 0 : i32
    return %c0_i32, %c0_i32_0 : i32, i32
  }
  func.func @transform_6(%arg0: i32) -> (i32, i32) {
    %c0_i32 = arith.constant 0 : i32
    %c0_i32_0 = arith.constant 0 : i32
    %c0_i32_1 = arith.constant 0 : i32
    return %c0_i32, %c0_i32_0 : i32, i32
  }
  func.func @transform_7(%arg0: i32) -> (i32, i32) {
    %c0_i32 = arith.constant 0 : i32
    %c0_i32_0 = arith.constant 0 : i32
    %c0_i32_1 = arith.constant 0 : i32
    return %c0_i32, %c0_i32_0 : i32, i32
  }
  func.func @transform_8(%arg0: i32) -> (i32, i32) {
    %c0_i32 = arith.constant 0 : i32
    %c0_i32_0 = arith.constant 0 : i32
    %c0_i32_1 = arith.constant 0 : i32
    return %c0_i32, %c0_i32_0 : i32, i32
  }
  func.func @transform_9(%arg0: i32) -> (i32, i32) {
    %c0_i32 = arith.constant 0 : i32
    %c0_i32_0 = arith.constant 0 : i32
    %c0_i32_1 = arith.constant 0 : i32
    return %c0_i32, %c0_i32_0 : i32, i32
  }
  func.func @transform_10(%arg0: i32) -> (i32, i32) {
    %c0_i32 = arith.constant 0 : i32
    %c0_i32_0 = arith.constant 0 : i32
    %c0_i32_1 = arith.constant 0 : i32
    return %c0_i32, %c0_i32_0 : i32, i32
  }
  func.func @transform_11(%arg0: i32) -> (i32, i32, i32) {
    %c0_i32 = arith.constant 0 : i32
    %c0_i32_0 = arith.constant 0 : i32
    %c0_i32_1 = arith.constant 0 : i32
    return %arg0, %c0_i32, %c0_i32_0 : i32, i32, i32
  }
}

module attributes {stable_mosaic.version = 11 : i64} {
  func.func @_ffn_ln_kernel(%arg0: i32, %arg1: memref<16x32xf32, #tpu.memory_space<vmem>>, %arg2: memref<32x64xbf16, #tpu.memory_space<vmem>>, %arg3: memref<1x64xf32, #tpu.memory_space<vmem>>, %arg4: memref<64x32xbf16, #tpu.memory_space<vmem>>, %arg5: memref<1x32xf32, #tpu.memory_space<vmem>>, %arg6: memref<1x32xf32, #tpu.memory_space<vmem>>, %arg7: memref<1x32xf32, #tpu.memory_space<vmem>>, %arg8: memref<16x32xf32, #tpu.memory_space<vmem>>) attributes {dimension_semantics = [#tpu.dimension_semantics<parallel>], iteration_bounds = array<i64: 1>, scalar_prefetch = 0 : i64, scratch_operands = 0 : i64, tpu.core_type = #tpu.core_type<tc>, window_params = [{transform_indices = @transform_0, window_bounds = array<i64: 16, 32>}, {pipeline_mode = #tpu.pipeline_mode<synchronous>, transform_indices = @transform_1, window_bounds = array<i64: 32, 64>}, {pipeline_mode = #tpu.pipeline_mode<synchronous>, transform_indices = @transform_2, window_bounds = array<i64: 1, 64>}, {pipeline_mode = #tpu.pipeline_mode<synchronous>, transform_indices = @transform_3, window_bounds = array<i64: 64, 32>}, {pipeline_mode = #tpu.pipeline_mode<synchronous>, transform_indices = @transform_4, window_bounds = array<i64: 1, 32>}, {pipeline_mode = #tpu.pipeline_mode<synchronous>, transform_indices = @transform_5, window_bounds = array<i64: 1, 32>}, {pipeline_mode = #tpu.pipeline_mode<synchronous>, transform_indices = @transform_6, window_bounds = array<i64: 1, 32>}, {transform_indices = @transform_7, window_bounds = array<i64: 16, 32>}]} {
    %c0 = arith.constant 0 : index
    %c0_0 = arith.constant 0 : index
    %0 = vector.load %arg1[%c0, %c0_0] : memref<16x32xf32, #tpu.memory_space<vmem>>, vector<16x32xf32>
    %1 = arith.truncf %0 : vector<16x32xf32> to vector<16x32xbf16>
    %c0_1 = arith.constant 0 : index
    %c0_2 = arith.constant 0 : index
    %2 = vector.load %arg2[%c0_1, %c0_2] : memref<32x64xbf16, #tpu.memory_space<vmem>>, vector<32x64xbf16>
    %cst = arith.constant dense<0.000000e+00> : vector<16x64xf32>
    %3 = tpu.matmul %1, %2, %cst {dimension_numbers = #tpu.dot_dimension_numbers<[1], [0], [0], [1], [0, 0, 1, 1], [], []>} : vector<16x32xbf16>, vector<32x64xbf16>, vector<16x64xf32> -> vector<16x64xf32>
    %c0_3 = arith.constant 0 : index
    %c0_4 = arith.constant 0 : index
    %4 = vector.load %arg3[%c0_3, %c0_4] : memref<1x64xf32, #tpu.memory_space<vmem>>, vector<1x64xf32>
    %5 = vector.broadcast %4 : vector<1x64xf32> to vector<16x64xf32>
    %6 = arith.addf %3, %5 : vector<16x64xf32>
    %cst_5 = arith.constant 0.000000e+00 : f32
    %7 = vector.broadcast %cst_5 : f32 to vector<16x64xf32>
    %8 = arith.maximumf %6, %7 : vector<16x64xf32>
    %9 = arith.truncf %8 : vector<16x64xf32> to vector<16x64xbf16>
    %c0_6 = arith.constant 0 : index
    %c0_7 = arith.constant 0 : index
    %10 = vector.load %arg4[%c0_6, %c0_7] : memref<64x32xbf16, #tpu.memory_space<vmem>>, vector<64x32xbf16>
    %cst_8 = arith.constant dense<0.000000e+00> : vector<16x32xf32>
    %11 = tpu.matmul %9, %10, %cst_8 {dimension_numbers = #tpu.dot_dimension_numbers<[1], [0], [0], [1], [0, 0, 1, 1], [], []>} : vector<16x64xbf16>, vector<64x32xbf16>, vector<16x32xf32> -> vector<16x32xf32>
    %c0_9 = arith.constant 0 : index
    %c0_10 = arith.constant 0 : index
    %12 = vector.load %arg5[%c0_9, %c0_10] : memref<1x32xf32, #tpu.memory_space<vmem>>, vector<1x32xf32>
    %13 = vector.broadcast %12 : vector<1x32xf32> to vector<16x32xf32>
    %14 = arith.addf %11, %13 : vector<16x32xf32>
    %15 = arith.addf %0, %14 : vector<16x32xf32>
    %cst_11 = arith.constant dense<0.000000e+00> : vector<16xf32>
    %16 = vector.multi_reduction <add>, %15, %cst_11 [1] : vector<16x32xf32> to vector<16xf32>
    %17 = vector.shape_cast %16 : vector<16xf32> to vector<16x1xf32>
    %cst_12 = arith.constant 3.200000e+01 : f32
    %18 = vector.broadcast %cst_12 : f32 to vector<16x1xf32>
    %19 = arith.divf %17, %18 : vector<16x1xf32>
    %20 = vector.broadcast %19 : vector<16x1xf32> to vector<16x32xf32>
    %21 = arith.subf %15, %20 : vector<16x32xf32>
    %22 = arith.mulf %21, %21 : vector<16x32xf32>
    %cst_13 = arith.constant dense<0.000000e+00> : vector<16xf32>
    %23 = vector.multi_reduction <add>, %22, %cst_13 [1] : vector<16x32xf32> to vector<16xf32>
    %24 = vector.shape_cast %23 : vector<16xf32> to vector<16x1xf32>
    %cst_14 = arith.constant 3.200000e+01 : f32
    %25 = vector.broadcast %cst_14 : f32 to vector<16x1xf32>
    %26 = arith.divf %24, %25 : vector<16x1xf32>
    %27 = vector.broadcast %19 : vector<16x1xf32> to vector<16x32xf32>
    %28 = arith.subf %15, %27 : vector<16x32xf32>
    %cst_15 = arith.constant 9.99999974E-6 : f32
    %29 = vector.broadcast %cst_15 : f32 to vector<16x1xf32>
    %30 = arith.addf %26, %29 : vector<16x1xf32>
    %31 = math.rsqrt %30 : vector<16x1xf32>
    %32 = vector.broadcast %31 : vector<16x1xf32> to vector<16x32xf32>
    %33 = arith.mulf %28, %32 : vector<16x32xf32>
    %c0_16 = arith.constant 0 : index
    %c0_17 = arith.constant 0 : index
    %34 = vector.load %arg6[%c0_16, %c0_17] : memref<1x32xf32, #tpu.memory_space<vmem>>, vector<1x32xf32>
    %35 = vector.broadcast %34 : vector<1x32xf32> to vector<16x32xf32>
    %36 = arith.mulf %33, %35 : vector<16x32xf32>
    %c0_18 = arith.constant 0 : index
    %c0_19 = arith.constant 0 : index
    %37 = vector.load %arg7[%c0_18, %c0_19] : memref<1x32xf32, #tpu.memory_space<vmem>>, vector<1x32xf32>
    %38 = vector.broadcast %37 : vector<1x32xf32> to vector<16x32xf32>
    %39 = arith.addf %36, %38 : vector<16x32xf32>
    %c0_20 = arith.constant 0 : index
    %c0_21 = arith.constant 0 : index
    %40 = vector.load %arg8[%c0_20, %c0_21] : memref<16x32xf32, #tpu.memory_space<vmem>>, vector<16x32xf32>
    tpu.vector_store %arg8[%c0_20, %c0_21], %39 {strides = array<i32>} : memref<16x32xf32, #tpu.memory_space<vmem>>, vector<16x32xf32>,
    return
  }
  func.func @transform_0(%arg0: i32) -> (i32, i32) {
    %c0_i32 = arith.constant 0 : i32
    %c0_i32_0 = arith.constant 0 : i32
    return %arg0, %c0_i32 : i32, i32
  }
  func.func @transform_1(%arg0: i32) -> (i32, i32) {
    %c0_i32 = arith.constant 0 : i32
    %c0_i32_0 = arith.constant 0 : i32
    %c0_i32_1 = arith.constant 0 : i32
    return %c0_i32, %c0_i32_0 : i32, i32
  }
  func.func @transform_2(%arg0: i32) -> (i32, i32) {
    %c0_i32 = arith.constant 0 : i32
    %c0_i32_0 = arith.constant 0 : i32
    %c0_i32_1 = arith.constant 0 : i32
    return %c0_i32, %c0_i32_0 : i32, i32
  }
  func.func @transform_3(%arg0: i32) -> (i32, i32) {
    %c0_i32 = arith.constant 0 : i32
    %c0_i32_0 = arith.constant 0 : i32
    %c0_i32_1 = arith.constant 0 : i32
    return %c0_i32, %c0_i32_0 : i32, i32
  }
  func.func @transform_4(%arg0: i32) -> (i32, i32) {
    %c0_i32 = arith.constant 0 : i32
    %c0_i32_0 = arith.constant 0 : i32
    %c0_i32_1 = arith.constant 0 : i32
    return %c0_i32, %c0_i32_0 : i32, i32
  }
  func.func @transform_5(%arg0: i32) -> (i32, i32) {
    %c0_i32 = arith.constant 0 : i32
    %c0_i32_0 = arith.constant 0 : i32
    %c0_i32_1 = arith.constant 0 : i32
    return %c0_i32, %c0_i32_0 : i32, i32
  }
  func.func @transform_6(%arg0: i32) -> (i32, i32) {
    %c0_i32 = arith.constant 0 : i32
    %c0_i32_0 = arith.constant 0 : i32
    %c0_i32_1 = arith.constant 0 : i32
    return %c0_i32, %c0_i32_0 : i32, i32
  }
  func.func @transform_7(%arg0: i32) -> (i32, i32) {
    %c0_i32 = arith.constant 0 : i32
    %c0_i32_0 = arith.constant 0 : i32
    return %arg0, %c0_i32 : i32, i32
  }
}

</mosaic_0001>

<bundles_post_ra>
// kernel: encoder_decoder_forward.11
= control target key start
LH: loop header
LB: loop body
LE: loop exit
PB: predicated region body
PF: predicated region fallthrough
CT: control target
= control target key end

     0   :  { %v290_v0 = vmov 0.0   ;;  %vm291_vm0 = vmmov 0   ;;  %vm53_vm1 = vcmask 261120   ;;  %vm140_vm2 = vcmask 523264   ;;  %s381_s1 = inlined_call_operand.vmem [shape: bf16[32,64], index: 1, kind: input, shape index: {}]   ;;  %s382_s0 = inlined_call_operand.vmem [shape: f32[16,32], index: 0, kind: input, shape index: {}]   ;;  %s383_s3 = inlined_call_operand.vmem [shape: bf16[64,32], index: 3, kind: input, shape index: {}]   ;;  %s384_s2 = inlined_call_operand.vmem [shape: f32[1,64], index: 2, kind: input, shape index: {}]   ;;  %s385_s4 = inlined_call_operand.vmem [shape: f32[1,32], index: 4, kind: input, shape index: {}]   ;;  %s386_s5 = inlined_call_operand.vmem [shape: f32[1,32], index: 5, kind: input, shape index: {}]   ;;  %s387_s6 = inlined_call_operand.vmem [shape: f32[1,32], index: 6, kind: input, shape index: {}]   ;;  %s388_s7 = inlined_call_operand.vmem [shape: f32[16,32], index: 7, kind: output, shape index: {}]  }
   0x1   :  { %258 = vmatprep.subr.bf16.mxu0 %v290_v0  ;;  %v280_v1 = vld [vmem:[%s381_s1 + $0x8] sm:$0xff]   ;;  %262 = vmatprep.mubr.msk.bf16.mxu0 %vm291_vm0, %v290_v0  ;;  %v281_v2 = vld [vmem:[%s381_s1] sm:$0xff]   ;;  %v282_v5 = vld [vmem:[%s383_s3 + $0x18] sm:$0xff]  }
   0x2   :  { %266 = vmatprep.subr.bf16.mxu1 %v290_v0  ;;  %274 = vmatprep.mubr.msk.bf16.mxu1 %vm291_vm0, %v290_v0  ;;  %v27_v3 = vld [vmem:[%s382_s0] sm:$0xff]  ;;  %v28_v4 = vld [vmem:[%s382_s0 + $0x8] sm:$0xff]  ;;  %v283_v7 = vld [vmem:[%s383_s3 + $0x10] sm:$0xff]  }
   0x3   :  { %259 = vmatpush3.bf16.msra.mxu0 %v280_v1  ;;  %v29_v6 = vpack.c.bf16 %v28_v4, %v27_v3  ;;  %267 = vmatpush3.bf16.msra.mxu1 %v282_v5  ;;  %v284_v8 = vld [vmem:[%s383_s3 + $0x8] sm:$0xff]   ;;  %v285_v9 = vld [vmem:[%s383_s3] sm:$0xff]  }
   0x4   :  { %260 = vmatprep.subr.bf16.mxu0 %v290_v0  ;;  %268 = vmatprep.subr.bf16.mxu1 %v290_v0  ;;  %v238_v10 = vld [vmem:[%s384_s2] ss:$0 sm:$0xff] }
   0x5   :  { %v242_v20 = vld [vmem:[%s385_s4] ss:$0 sm:$0xff] }
   0x6   :  { %v248_v48 = vld [vmem:[%s386_s5] ss:$0 sm:$0xff] }
   0x7   :  { %261 = vmatpush3.bf16.msra.mxu0 %v281_v2  ;;  %269 = vmatpush3.bf16.msra.mxu1 %v283_v7  ;;  %v249_v50 = vld [vmem:[%s387_s6] ss:$0 sm:$0xff] }
   0x8   :  { %270 = vmatprep.subr.bf16.mxu1 %v290_v0 }
   0xa   :  { %263 = vmatmul.mubr.msk.bf16.vlgmr.msra.gmra.mxu0 %vm53_vm1, %v29_v6 }
   0xb   :  { %271 = vmatpush3.bf16.msra.mxu1 %v284_v8 }
   0xc   :  { %272 = vmatprep.subr.bf16.mxu1 %v290_v0 }
   0xf   :  { %273 = vmatpush3.bf16.msra.mxu1 %v285_v9 }
  0xca   :  { %v91_v11 = vpop.f32.mrf.mxu0 }
  0xcb   :  { %v92_v13 = vadd.f32 %v238_v10, %v91_v11 }
  0xcc   :  { %v264_v12 = vpop.f32.mrf.mxu0 }
  0xcd   :  { %v98_v17 = vmax.f32 %v92_v13, 0.0 }
  0xce   :  { %v94_v14 = vpop.f32.mrf.mxu0 }
  0xcf   :  { %v95_v15 = vadd.f32 %v238_v10, %v94_v14 }
  0xd0   :  { %v265_v16 = vpop.f32.mrf.mxu0 }
  0xd1   :  { %v99_v18 = vmax.f32 %v95_v15, 0.0 }
  0xd3   :  { %v100_v19 = vpack.c.bf16 %v99_v18, %v98_v17 }
  0xd5   :  { %275 = vmatmul.mubr.msk.bf16.vlgmr.msra.gmra.mxu1 %vm140_vm2, %v100_v19 }
 0x195   :  { %v178_v21 = vpop.f32.mrf.mxu1 }
 0x196   :  { %v179_v22 = vadd.f32 %v242_v20, %v178_v21 }
 0x197   :  { %v276_v23 = vpop.f32.mrf.mxu1 }
 0x198   :  { %v185_v24 = vadd.f32 %v179_v22, %v27_v3 }
 0x199   :  { %v181_v25 = vpop.f32.mrf.mxu1 }
 0x19a   :  { %v182_v26 = vadd.f32 %v242_v20, %v181_v25  ;;  %v187_v27 = vsel %vm53_vm1, %v185_v24, 0.0 }
 0x19b   :  { %188 = vadd.xlane.f32.xlu0 %v187_v27  ;;  %v277_v28 = vpop.f32.mrf.mxu1 }
 0x19c   :  { %v186_v29 = vadd.f32 %v182_v26, %v28_v4 }
 0x19e   :  { %v190_v30 = vsel %vm53_vm1, %v186_v29, 0.0 }
 0x19f   :  { %191 = vadd.xlane.f32.xlu0 %v190_v30 }
 0x224   :  { %v189_v31 = vpop.xlane.xlu0 %188 }
 0x225   :  { %v194_v32 = vmul.f32 0.03125, %v189_v31 }
 0x227   :  { %v196_v33 = vsub.f32 %v185_v24, %v194_v32 }
 0x228   :  { %v192_v34 = vpop.xlane.xlu0 %191 }
 0x229   :  { %v195_v35 = vmul.f32 0.03125, %v192_v34  ;;  %v198_v36 = vmul.f32 %v196_v33, %v196_v33 }
 0x22b   :  { %v197_v37 = vsub.f32 %v186_v29, %v195_v35  ;;  %v200_v38 = vsel %vm53_vm1, %v198_v36, 0.0 }
 0x22c   :  { %201 = vadd.xlane.f32.xlu1 %v200_v38 }
 0x22d   :  { %v199_v39 = vmul.f32 %v197_v37, %v197_v37 }
 0x22f   :  { %v203_v40 = vsel %vm53_vm1, %v199_v39, 0.0 }
 0x230   :  { %204 = vadd.xlane.f32.xlu1 %v203_v40 }
 0x2b5   :  { %v202_v41 = vpop.xlane.xlu1 %201 }
 0x2b6   :  { %v206_v42 = vmul.f32 0.03125, %v202_v41 }
 0x2b8   :  { %v208_v43 = vadd.f32 1e-05, %v206_v42 }
 0x2b9   :  { %v205_v44 = vpop.xlane.xlu1 %204 }
 0x2ba   :  { %286 = vrsqrt.f32 %v208_v43  ;;  %v207_v45 = vmul.f32 0.03125, %v205_v44 }
 0x2bc   :  { %v209_v46 = vadd.f32 1e-05, %v207_v45 }
 0x2be   :  { %288 = vrsqrt.f32 %v209_v46 }
 0x2c7   :  { %v287_v47 = vpop.eup %286 }
 0x2c8   :  { %v212_v49 = vmul.f32 %v287_v47, %v196_v33 }
 0x2ca   :  { %v221_v51 = vmul.f32 %v248_v48, %v212_v49 }
 0x2cb   :  { %v289_v52 = vpop.eup %288 }
 0x2cc   :  { %v230_v53 = vadd.f32 %v249_v50, %v221_v51  ;;  %v213_v54 = vmul.f32 %v289_v52, %v197_v37 }
 0x2ce   :  { %232 = vst.msk [vmem:[%s388_s7] sm:$0xff] %vm53_vm1, %v230_v53  ;;  %v222_v55 = vmul.f32 %v248_v48, %v213_v54 }
 0x2d0   :  { %v231_v56 = vadd.f32 %v249_v50, %v222_v55 }
 0x2d2   :  { %233 = vst.msk [vmem:[%s388_s7 + $0x8] sm:$0xff] %vm53_vm1, %v231_v56 }

// kernel: encoder_decoder_forward.14
= control target key start
LH: loop header
LB: loop body
LE: loop exit
PB: predicated region body
PF: predicated region fallthrough
CT: control target
= control target key end

     0   :  { %s1582_s17 = smov 0   ;;  %s1769_s0 = inlined_call_operand.vmem [shape: f32[2,8,32], index: 0, kind: input, shape index: {}, may-alias: {0,1}]   ;;  %s1770_s1 = inlined_call_operand.vmem [shape: f32[2,8,32], index: 1, kind: input, shape index: {}, may-alias: {0,1}]   ;;  %s1771_s2 = inlined_call_operand.vmem [shape: f32[2,8,8], index: 2, kind: input, shape index: {}]   ;;  %s1772_s3 = inlined_call_operand.vmem [shape: bf16[32,32], index: 3, kind: input, shape index: {}]   ;;  %s1773_s4 = inlined_call_operand.vmem [shape: f32[1,32], index: 4, kind: input, shape index: {}]   ;;  %s1774_s5 = inlined_call_operand.vmem [shape: bf16[32,64], index: 5, kind: input, shape index: {}]   ;;  %s1775_s6 = inlined_call_operand.vmem [shape: f32[1,64], index: 6, kind: input, shape index: {}]   ;;  %s1776_s7 = inlined_call_operand.vmem [shape: bf16[32,32], index: 7, kind: input, shape index: {}]   ;;  %s1777_s8 = inlined_call_operand.vmem [shape: f32[1,32], index: 8, kind: input, shape index: {}]   ;;  %s1778_s9 = inlined_call_operand.vmem [shape: f32[1,32], index: 9, kind: input, shape index: {}]   ;;  %s1779_s10 = inlined_call_operand.vmem [shape: f32[1,32], index: 10, kind: input, shape index: {}]   ;;  %s1780_s11 = inlined_call_operand.vmem [shape: f32[2,8,32], index: 11, kind: output, shape index: {}]  }
   0x1 LB: > { %s1314_s18 = sadd.s32 4294967295, %s1511_s17   ;;  %p1318_p0 = scmp.ge.s32.totalorder %s1511_s17, 1  ;;  %s1511_s17 = sphi %s1582_s17, %s21_s17  }
   0x2   : > { %p354_p1 = scmp.lt.s32.totalorder %s1511_s17, 3 }
   0x4   : > { %p355_p2 = pnand %p1318_p0, %p354_p1 }
   0x5   : > { %p400_p3 = scmp.lt.s32.totalorder (!%p355_p2), %s1314_s18, 1  ;;  %s1515_s20 = smov (!%p355_p2), 120  }
   0x6   : > { %358 = sbr.rel (%p355_p2) target bundleno = 2778 (0xada), region = 64  ;;  %s1516_s24 = smov (!%p355_p2), 96  }
   0x7   : > { %s1517_s25 = smov (!%p355_p2), 88   ;;  %s1518_s26 = smov (!%p355_p2), 112  }
   0x8   : > { %s1519_s13 = smov (!%p355_p2), 80  }
   0xb   : > { %v1483_v0 = vld [vmem:[%s1774_s5 + $0x8] sm:$0xff]   ;;  %v1513_v1 = vmov 0.0   ;;  %v1485_v3 = vld [vmem:[%s1774_s5] sm:$0xff]   ;;  %vm1514_vm0 = vmmov 0   ;;  %s1782_s18 = smov (!%p400_p3, %s1314_s18), 1  ;;  %vm444_vm1 = vcmask 261120  }
   0xc   : > { %1386 = vmatprep.subr.bf16.mxu1 %v1513_v1  ;;  %1378 = vmatprep.subr.bf16.mxu0 %v1513_v1  ;;  %v1484_v2 = vld [vmem:[%s1772_s3 + $0x8] sm:$0xff]   ;;  %v1486_v4 = vld [vmem:[%s1772_s3] sm:$0xff]   ;;  %s1610_s27 = sshll.u32 %s1782_s18, 3  ;;  %vm558_vm2 = vcmask 64512   ;;  %vm625_vm4 = vcmask 1043456   ;;  %s1521_s18 = smov 72  }
   0xd   : > { %1387 = vmatpush3.bf16.msra.mxu1 %v1483_v0  ;;  %1390 = vmatprep.mubr.msk.bf16.mxu1 %vm1514_vm0, %v1513_v1  ;;  %s407_s30 = scalar_lea.vmem %s1770_s1, %s1610_s27  ;;  %s403_s14 = scalar_lea.vmem %s1769_s0, %s1610_s27  ;;  %v1327_v9 = vld [vmem:[%s1775_s6] ss:$0 sm:$0xff]  ;;  %v784_v57 = vld [vmem:[%s1776_s7 + $0x4] sm:$0xf] }
   0xe   : > { %1379 = vmatpush3.bf16.msra.mxu0 %v1484_v2  ;;  %1388 = vmatprep.subr.bf16.mxu1 %v1513_v1  ;;  %v418_v5 = vld [vmem:[%s407_s30] sm:$0xff]  ;;  %s411_s23 = scalar_lea.vmem %s1771_s2, %s1610_s27  ;;  %v789_v58 = vsel %vm625_vm4, %v784_v57, 0  ;;  %s415_s30 = scalar_lea.vmem %s1780_s11, %s1610_s27 }
   0xf   : > { %1380 = vmatprep.subr.bf16.mxu0 %v1513_v1  ;;  %1382 = vmatprep.mubr.msk.bf16.mxu0 %vm1514_vm0, %v1513_v1  ;;  %v488_v6 = vpack.c.bf16 %v418_v5, %v418_v5  ;;  %v1622_v7 = vld [vmem:[%s403_s14] sm:$0xff]  ;;  %s1520_s14 = smov 104  }
  0x10   : > { %v420_v8 = vpack.c.bf16 %v1622_v7, %v1622_v7  ;;  %v1323_v10 = vld [vmem:[%s1773_s4] ss:$0 sm:$0xff] }
  0x11   : > { %1389 = vmatpush3.bf16.msra.mxu1 %v1485_v3  ;;  %v1660_v28 = vld [vmem:[%s411_s23] sm:$0xff] }
  0x12   : > { %1381 = vmatpush3.bf16.msra.mxu0 %v1486_v4  ;;  %1400 = vmatprep.subr.bf16.mxu1 %v1513_v1  ;;  %vm605_vm3 = vcmp.gt.f32.partialorder %v1660_v28, 0.5  ;;  %v670_v63 = vld [vmem:[%s1776_s7] sm:$0xf] }
  0x13   : > { %1394 = vmatprep.subr.bf16.mxu0 %v1513_v1  ;;  %v835_v3 = vsel %vm625_vm4, %v670_v63, 0 }
  0x14   : > { %1391 = vmatmul.mubr.msk.bf16.vlgmr.msra.gmra.mxu1 %vm444_vm1, %v488_v6 }
  0x15   : > { %1383 = vmatmul.mubr.msk.bf16.vlgmr.msra.gmra.mxu0 %vm444_vm1, %v420_v8  ;;  %1402 = vmatprep.mubr.msk.bf16.mxu1 %vm1514_vm0, %v1513_v1 }
  0x16   : > { %1396 = vmatprep.mubr.msk.bf16.mxu0 %vm1514_vm0, %v1513_v1 }
  0xd4   : > { %v549_v11 = vpop.f32.mrf.mxu1 }
  0xd5   : > { %v550_v12 = vadd.f32 %v1327_v9, %v549_v11  ;;  %v482_v13 = vpop.f32.mrf.mxu0 }
  0xd6   : > { %v483_v14 = vadd.f32 %v1323_v10, %v482_v13  ;;  %v1392_v15 = vpop.f32.mrf.mxu1 }
  0xd7   : > { %v1638_v16 = vpack.c.bf16 %v550_v12, %v550_v12  ;;  %v1384_v17 = vpop.f32.mrf.mxu0 }
  0xd8   : > { %v555_v18 = vmul.f32 0.35355338, %v483_v14  ;;  %v552_v19 = vpop.f32.mrf.mxu1 }
  0xd9   : > { %674 = vrot.lane.b32.xlu0 %v1638_v16, %s1515_s20  ;;  %v485_v20 = vpop.f32.mrf.mxu0  ;;  %v563_v21 = vsel %vm558_vm2, %v1638_v16, 0 }
  0xda   : > { %v1643_v22 = vpack.c.bf16 %v555_v18, %v555_v18  ;;  %v1393_v23 = vpop.f32.mrf.mxu1  ;;  %1395 = vmatpush3.bf16.xpose.msra.mxu0 %v563_v21 }
  0xdb   : > { %v1385_v24 = vpop.f32.mrf.mxu0  ;;  %1406 = vmatprep.subr.bf16.mxu0 %v1513_v1 }
  0xdd   : > { %672 = vrot.lane.b32.xlu0 %v1643_v22, %s1515_s20 }
  0xe1   : > { %1397 = vmatmul.mubr.msk.bf16.vlgmr.msra.gmra.mxu0 %vm558_vm2, %v1643_v22 }
  0xe2   : > { %1408 = vmatprep.mubr.msk.bf16.mxu0 %vm1514_vm0, %v1513_v1 }
 0x14b   : > { %v675_v25 = vpop.permute.xlu0 %674 }
 0x14c   : > { %v680_v26 = vsel %vm558_vm2, %v675_v25, 0 }
 0x14d   : > { %1407 = vmatpush3.bf16.xpose.msra.mxu0 %v680_v26 }
 0x14e   : > { %1418 = vmatprep.subr.bf16.mxu0 %v1513_v1 }
 0x14f   : > { %v673_v27 = vpop.permute.xlu0 %672 }
 0x154   : > { %1409 = vmatmul.mubr.msk.bf16.vlgmr.msra.gmra.mxu0 %vm558_vm2, %v673_v27 }
 0x155   : > { %1420 = vmatprep.mubr.msk.bf16.mxu0 %vm1514_vm0, %v1513_v1  ;;  %1419 = vmatpush3.bf16.msra.mxu0 %v789_v58 }
 0x156   : > { %1430 = vmatprep.subr.bf16.mxu0 %v1513_v1 }
 0x1a1   : > { %v599_v29 = vpop.f32.mrf.mxu0 }
 0x1a2   : > { %v606_v30 = vsel %vm605_vm3, %v599_v29, -1e+09 }
 0x1a3   : > { %v1398_v31 = vpop.f32.mrf.mxu0  ;;  %v607_v32 = vsel %vm558_vm2, %v606_v30, -inf }
 0x1a4   : > { %608 = vmax.xlane.f32.xlu1 %v607_v32 }
 0x1a5   : > { %v602_v33 = vpop.f32.mrf.mxu0 }
 0x1a7   : > { %v1399_v34 = vpop.f32.mrf.mxu0 }
 0x214   : > { %v716_v35 = vpop.f32.mrf.mxu0 }
 0x215   : > { %v722_v36 = vsel %vm605_vm3, %v716_v35, -1e+09 }
 0x216   : > { %v1410_v37 = vpop.f32.mrf.mxu0  ;;  %v723_v38 = vsel %vm558_vm2, %v722_v36, -inf }
 0x217   : > { %724 = vmax.xlane.f32.xlu1 %v723_v38 }
 0x218   : > { %v719_v39 = vpop.f32.mrf.mxu0 }
 0x21a   : > { %v1411_v40 = vpop.f32.mrf.mxu0 }
 0x228   : > { %620 = vrot.lane.b32.xlu1 %v1638_v16, %s1516_s24 }
 0x22d   : > { %v609_v41 = vpop.xlane.xlu1 %608 }
 0x22e   : > { %v610_v42 = vsub.f32 %v606_v30, %v609_v41 }
 0x230   : > { %v611_v43 = vmul.f32 1.442695, %v610_v42 }
 0x232   : > { %1487 = vpow2.f32 %v611_v43 }
 0x23f   : > { %v1488_v44 = vpop.eup %1487 }
 0x240   : > { %v613_v45 = vsel %vm558_vm2, %v1488_v44, 0.0 }
 0x241   : > { %614 = vadd.xlane.f32.xlu0 %v613_v45 }
 0x2a0   : > { %v725_v46 = vpop.xlane.xlu1 %724 }
 0x2a1   : > { %v726_v47 = vsub.f32 %v722_v36, %v725_v46 }
 0x2a3   : > { %v727_v48 = vmul.f32 1.442695, %v726_v47 }
 0x2a4   : > { %v621_v49 = vpop.permute.xlu1 %620 }
 0x2a5   : > { %1489 = vpow2.f32 %v727_v48  ;;  %v627_v50 = vsel %vm625_vm4, %v621_v49, 0  ;;  %v989_v48 = vld [vmem:[%s1776_s7 + $0x8] sm:$0xf] }
 0x2a6   : > { %1401 = vmatpush3.bf16.msra.mxu1 %v627_v50  ;;  %v994_v49 = vsel %vm625_vm4, %v989_v48, 0 }
 0x2a7   : > { %1412 = vmatprep.subr.bf16.mxu1 %v1513_v1 }
 0x2b2   : > { %v1490_v51 = vpop.eup %1489 }
 0x2b3   : > { %v729_v52 = vsel %vm558_vm2, %v1490_v51, 0.0 }
 0x2b4   : > { %730 = vadd.xlane.f32.xlu1 %v729_v52 }
 0x2c5   : > { %735 = vrot.lane.b32.xlu1 %v1638_v16, %s1517_s25 }
 0x2c9   : > { %879 = vrot.lane.b32.xlu1 %v1638_v16, %s1518_s26 }
 0x2ca   : > { %v615_v53 = vpop.xlane.xlu0 %614 }
 0x2cb   : > { %1491 = vrcp.f32 %v615_v53 }
 0x2cd   : > { %877 = vrot.lane.b32.xlu1 %v1643_v22, %s1518_s26 }
 0x2d8   : > { %v1492_v54 = vpop.eup %1491 }
 0x2d9   : > { %v617_v55 = vmul.f32 %v1492_v54, %v1488_v44 }
 0x2db   : > { %v618_v56 = vpack.c.bf16 %v617_v55, %v617_v55 }
 0x2dd   : > { %1403 = vmatmul.mubr.msk.bf16.vlgmr.msra.gmra.mxu1 %vm558_vm2, %v618_v56 }
 0x2de   : > { %1414 = vmatprep.mubr.msk.bf16.mxu1 %vm1514_vm0, %v1513_v1 }
 0x33d   : > { %v731_v59 = vpop.xlane.xlu1 %730 }
 0x33e   : > { %1493 = vrcp.f32 %v731_v59 }
 0x341   : > { %v736_v60 = vpop.permute.xlu1 %735 }
 0x342   : > { %v741_v61 = vsel %vm625_vm4, %v736_v60, 0 }
 0x343   : > { %1413 = vmatpush3.bf16.msra.mxu1 %v741_v61 }
 0x344   : > { %1424 = vmatprep.subr.bf16.mxu1 %v1513_v1 }
 0x345   : > { %v880_v10 = vpop.permute.xlu1 %879 }
 0x346   : > { %v885_v14 = vsel %vm558_vm2, %v880_v10, 0 }
 0x349   : > { %v878_v18 = vpop.permute.xlu1 %877 }
 0x34b   : > { %v1494_v62 = vpop.eup %1493 }
 0x34c   : > { %v733_v0 = vmul.f32 %v1494_v62, %v1490_v51 }
 0x34e   : > { %v734_v2 = vpack.c.bf16 %v733_v0, %v733_v0 }
 0x350   : > { %1415 = vmatmul.mubr.msk.bf16.vlgmr.msra.gmra.mxu1 %vm558_vm2, %v734_v2 }
 0x351   : > { %1425 = vmatpush3.bf16.msra.mxu1 %v835_v3  ;;  %1426 = vmatprep.mubr.msk.bf16.mxu1 %vm1514_vm0, %v1513_v1 }
 0x352   : > { %1436 = vmatprep.subr.bf16.mxu1 %v1513_v1 }
 0x39d   : > { %v663_v4 = vpop.f32.mrf.mxu1 }
 0x39e   : > { %v669_v5 = vpack.c.bf16 %v663_v4, %v663_v4  ;;  %v1149_v4 = vld [vmem:[%s1776_s7 + $0xc] sm:$0xf] }
 0x39f   : > { %v1404_v6 = vpop.f32.mrf.mxu1 }
 0x3a0   : > { %1427 = vmatmul.mubr.msk.bf16.vlgmr.msra.gmra.mxu1 %vm558_vm2, %v669_v5  ;;  %v1154_v6 = vsel %vm625_vm4, %v1149_v4, 0 }
 0x3a1   : > { %v666_v8 = vpop.f32.mrf.mxu1  ;;  %1438 = vmatprep.mubr.msk.bf16.mxu1 %vm1514_vm0, %v1513_v1 }
 0x3a3   : > { %v1405_v9 = vpop.f32.mrf.mxu1 }
 0x410   : > { %v777_v11 = vpop.f32.mrf.mxu1 }
 0x411   : > { %v783_v12 = vpack.c.bf16 %v777_v11, %v777_v11 }
 0x412   : > { %v1416_v13 = vpop.f32.mrf.mxu1 }
 0x413   : > { %1421 = vmatmul.mubr.msk.bf16.vlgmr.msra.gmra.mxu0 %vm558_vm2, %v783_v12 }
 0x414   : > { %1431 = vmatpush3.bf16.xpose.msra.mxu0 %v885_v14  ;;  %v780_v15 = vpop.f32.mrf.mxu1  ;;  %1432 = vmatprep.mubr.msk.bf16.mxu0 %vm1514_vm0, %v1513_v1 }
 0x415   : > { %1442 = vmatprep.subr.bf16.mxu0 %v1513_v1 }
 0x416   : > { %v1417_v17 = vpop.f32.mrf.mxu1 }
 0x41b   : > { %1433 = vmatmul.mubr.msk.bf16.vlgmr.msra.gmra.mxu0 %vm558_vm2, %v878_v18 }
 0x41c   : > { %1444 = vmatprep.mubr.msk.bf16.mxu0 %vm1514_vm0, %v1513_v1  ;;  %1443 = vmatpush3.bf16.msra.mxu0 %v994_v49 }
 0x41d   : > { %1454 = vmatprep.subr.bf16.mxu0 %v1513_v1 }
 0x460   : > { %v1706_v19 = vpop.f32.mrf.mxu1 }
 0x462   : > { %v1428_v20 = vpop.f32.mrf.mxu1 }
 0x464   : > { %v874_v21 = vpop.f32.mrf.mxu1 }
 0x466   : > { %v1429_v23 = vpop.f32.mrf.mxu1 }
 0x467   : > { %v1343_v23 = vld [vmem:[%s1777_s8] ss:$0 sm:$0xff] }
 0x4d3   : > { %v1708_v24 = vpop.f32.mrf.mxu0 }
 0x4d5   : > { %v1422_v25 = vpop.f32.mrf.mxu0 }
 0x4d7   : > { %v828_v26 = vpop.f32.mrf.mxu0 }
 0x4d9   : > { %v1423_v27 = vpop.f32.mrf.mxu0 }
 0x4db   : > { %v921_v29 = vpop.f32.mrf.mxu0 }
 0x4dc   : > { %v927_v30 = vsel %vm605_vm3, %v921_v29, -1e+09 }
 0x4dd   : > { %v1434_v31 = vpop.f32.mrf.mxu0  ;;  %v928_v32 = vsel %vm558_vm2, %v927_v30, -inf }
 0x4de   : > { %929 = vmax.xlane.f32.xlu0 %v928_v32 }
 0x4df   : > { %v924_v33 = vpop.f32.mrf.mxu0 }
 0x4e1   : > { %v1435_v34 = vpop.f32.mrf.mxu0 }
 0x4f4   : > { %940 = vrot.lane.b32.xlu0 %v1638_v16, %s1519_s13 }
 0x4f8   : > { %1039 = vrot.lane.b32.xlu0 %v1638_v16, %s1520_s14 }
 0x4fc   : > { %1037 = vrot.lane.b32.xlu0 %v1643_v22, %s1520_s14 }
 0x567   : > { %v930_v35 = vpop.xlane.xlu0 %929 }
 0x568   : > { %v931_v36 = vsub.f32 %v927_v30, %v930_v35 }
 0x56a   : > { %v932_v37 = vmul.f32 1.442695, %v931_v36 }
 0x56b   : > { %v941_v38 = vpop.permute.xlu0 %940 }
 0x56c   : > { %1495 = vpow2.f32 %v932_v37  ;;  %v946_v39 = vsel %vm625_vm4, %v941_v38, 0 }
 0x56d   : > { %1437 = vmatpush3.bf16.msra.mxu1 %v946_v39 }
 0x56e   : > { %1448 = vmatprep.subr.bf16.mxu1 %v1513_v1 }
 0x56f   : > { %v1040_v45 = vpop.permute.xlu0 %1039 }
 0x570   : > { %v1045_v46 = vsel %vm558_vm2, %v1040_v45, 0 }
 0x573   : > { %v1038_v47 = vpop.permute.xlu0 %1037 }
 0x579   : > { %v1496_v40 = vpop.eup %1495 }
 0x57a   : > { %v934_v41 = vsel %vm558_vm2, %v1496_v40, 0.0 }
 0x57b   : > { %935 = vadd.xlane.f32.xlu1 %v934_v41 }
 0x604   : > { %v936_v42 = vpop.xlane.xlu1 %935 }
 0x605   : > { %1497 = vrcp.f32 %v936_v42  ;;  %v1345_v42 = vld [vmem:[%s1779_s10] ss:$0 sm:$0xff] }
 0x612   : > { %v1498_v43 = vpop.eup %1497 }
 0x613   : > { %v938_v44 = vmul.f32 %v1498_v43, %v1496_v40 }
 0x615   : > { %v939_v22 = vpack.c.bf16 %v938_v44, %v938_v44 }
 0x617   : > { %1439 = vmatmul.mubr.msk.bf16.vlgmr.msra.gmra.mxu1 %vm558_vm2, %v939_v22 }
 0x618   : > { %1449 = vmatpush3.bf16.xpose.msra.mxu1 %v1045_v46  ;;  %1450 = vmatprep.mubr.msk.bf16.mxu1 %vm1514_vm0, %v1513_v1 }
 0x619   : > { %1460 = vmatprep.subr.bf16.mxu1 %v1513_v1 }
 0x61f   : > { %1451 = vmatmul.mubr.msk.bf16.vlgmr.msra.gmra.mxu1 %vm558_vm2, %v1038_v47 }
 0x620   : > { %1462 = vmatprep.mubr.msk.bf16.mxu1 %vm1514_vm0, %v1513_v1  ;;  %1461 = vmatpush3.bf16.msra.mxu1 %v1154_v6 }
 0x6d7   : > { %v982_v50 = vpop.f32.mrf.mxu1 }
 0x6d8   : > { %v988_v51 = vpack.c.bf16 %v982_v50, %v982_v50 }
 0x6d9   : > { %v1440_v52 = vpop.f32.mrf.mxu1 }
 0x6da   : > { %1445 = vmatmul.mubr.msk.bf16.vlgmr.msra.gmra.mxu0 %vm558_vm2, %v988_v51 }
 0x6db   : > { %v985_v53 = vpop.f32.mrf.mxu1  ;;  %1456 = vmatprep.mubr.msk.bf16.mxu0 %vm1514_vm0, %v1513_v1  ;;  %v872_v1 = vadd.f32 %v1706_v19, %v1708_v24 }
 0x6dd   : > { %v1441_v54 = vpop.f32.mrf.mxu1 }
 0x6df   : > { %v1081_v55 = vpop.f32.mrf.mxu1 }
 0x6e0   : > { %v1087_v56 = vsel %vm605_vm3, %v1081_v55, -1e+09 }
 0x6e1   : > { %v1452_v57 = vpop.f32.mrf.mxu1  ;;  %v1088_v58 = vsel %vm558_vm2, %v1087_v56, -inf }
 0x6e2   : > { %1089 = vmax.xlane.f32.xlu0 %v1088_v58 }
 0x6e3   : > { %v1084_v59 = vpop.f32.mrf.mxu1 }
 0x6e5   : > { %v1453_v60 = vpop.f32.mrf.mxu1 }
 0x76b   : > { %v1090_v61 = vpop.xlane.xlu0 %1089 }
 0x76c   : > { %v1091_v62 = vsub.f32 %v1087_v56, %v1090_v61 }
 0x76e   : > { %v1092_v63 = vmul.f32 1.442695, %v1091_v62 }
 0x770   : > { %1499 = vpow2.f32 %v1092_v63 }
 0x77d   : > { %v1500_v0 = vpop.eup %1499 }
 0x77e   : > { %v1094_v2 = vsel %vm558_vm2, %v1500_v0, 0.0 }
 0x77f   : > { %1095 = vadd.xlane.f32.xlu1 %v1094_v2 }
 0x790   : > { %1100 = vrot.lane.b32.xlu1 %v1638_v16, %s1521_s18 }
 0x79a   : > { %v1030_v28 = vpop.f32.mrf.mxu0 }
 0x79b   : > { %v1036_v3 = vadd.f32 %v1030_v28, %v872_v1 }
 0x79c   : > { %v1446_v5 = vpop.f32.mrf.mxu0 }
 0x79e   : > { %v1033_v8 = vpop.f32.mrf.mxu0 }
 0x7a0   : > { %v1447_v9 = vpop.f32.mrf.mxu0 }
 0x808   : > { %v1096_v10 = vpop.xlane.xlu1 %1095 }
 0x809   : > { %1501 = vrcp.f32 %v1096_v10 }
 0x80c   : > { %v1101_v11 = vpop.permute.xlu1 %1100 }
 0x80d   : > { %v1106_v16 = vsel %vm625_vm4, %v1101_v11, 0 }
 0x80e   : > { %1455 = vmatpush3.bf16.msra.mxu0 %v1106_v16 }
 0x816   : > { %v1502_v12 = vpop.eup %1501 }
 0x817   : > { %v1098_v13 = vmul.f32 %v1502_v12, %v1500_v0 }
 0x819   : > { %v1099_v14 = vpack.c.bf16 %v1098_v13, %v1098_v13 }
 0x81b   : > { %1457 = vmatmul.mubr.msk.bf16.vlgmr.msra.gmra.mxu0 %vm558_vm2, %v1099_v14 }
 0x8db   : > { %v1142_v15 = vpop.f32.mrf.mxu0 }
 0x8dc   : > { %v1148_v17 = vpack.c.bf16 %v1142_v15, %v1142_v15 }
 0x8dd   : > { %v1458_v18 = vpop.f32.mrf.mxu0 }
 0x8de   : > { %1463 = vmatmul.mubr.msk.bf16.vlgmr.msra.gmra.mxu1 %vm558_vm2, %v1148_v17 }
 0x8df   : > { %v1145_v19 = vpop.f32.mrf.mxu0 }
 0x8e1   : > { %v1459_v20 = vpop.f32.mrf.mxu0 }
 0x99e   : > { %v1190_v21 = vpop.f32.mrf.mxu1 }
 0x99f   : > { %v1196_v24 = vadd.f32 %v1190_v21, %v1036_v3 }
 0x9a0   : > { %v1464_v25 = vpop.f32.mrf.mxu1 }
 0x9a1   : > { %v1204_v26 = vadd.f32 %v1343_v23, %v1196_v24 }
 0x9a2   : > { %v1193_v27 = vpop.f32.mrf.mxu1 }
 0x9a3   : > { %v1205_v29 = vadd.f32 %v1204_v26, %v1622_v7  ;;  %v1344_v7 = vld [vmem:[%s1778_s9] ss:$0 sm:$0xff] }
 0x9a4   : > { %v1465_v30 = vpop.f32.mrf.mxu1 }
 0x9a5   : > { %v1206_v31 = vsel %vm444_vm1, %v1205_v29, 0.0 }
 0x9a6   : > { %1207 = vadd.xlane.f32.xlu1 %v1206_v31 }
 0xa2f   : > { %v1208_v32 = vpop.xlane.xlu1 %1207 }
 0xa30   : > { %v1210_v33 = vmul.f32 0.03125, %v1208_v32 }
 0xa32   : > { %v1211_v34 = vsub.f32 %v1205_v29, %v1210_v33 }
 0xa34   : > { %v1212_v35 = vmul.f32 %v1211_v34, %v1211_v34 }
 0xa36   : > { %v1213_v36 = vsel %vm444_vm1, %v1212_v35, 0.0 }
 0xa37   : > { %1214 = vadd.xlane.f32.xlu0 %v1213_v36 }
 0xac0   : > { %v1215_v37 = vpop.xlane.xlu0 %1214 }
 0xac1   : > { %v1216_v38 = vmul.f32 0.03125, %v1215_v37 }
 0xac3   : > { %v1217_v39 = vadd.f32 1e-05, %v1216_v38 }
 0xac5   : > { %1503 = vrsqrt.f32 %v1217_v39 }
 0xad2   : > { %v1504_v40 = vpop.eup %1503 }
 0xad3   : > { %v1219_v41 = vmul.f32 %v1504_v40, %v1211_v34 }
 0xad5   : > { %v1227_v43 = vmul.f32 %v1344_v7, %v1219_v41 }
 0xad7   : > { %v1235_v44 = vadd.f32 %v1345_v42, %v1227_v43 }
 0xad9   : > { %1236 = vst.msk [vmem:[%s415_s30] sm:$0xff] %vm444_vm1, %v1235_v44 }
 0xada PF: > { %s21_s17 = sadd.s32 1, %s1511_s17  }
 0xadb   : > { %p18_p4 = scmp.ge.s32.totalorder %s21_s17, 4  }
 0xadd   :  { %20 = sbr.rel (!%p18_p4) target bundleno = 1 (0x1), region = 100 }

// kernel: encoder_decoder_forward.19
= control target key start
LH: loop header
LB: loop body
LE: loop exit
PB: predicated region body
PF: predicated region fallthrough
CT: control target
= control target key end

     0   :  { %v328_v1 = vmov 0.0   ;;  %vm329_vm0 = vmmov 0   ;;  %vm54_vm1 = vcmask 261120   ;;  %s419_s0 = inlined_call_operand.vmem [shape: f32[16,32], index: 0, kind: input, shape index: {}]   ;;  %s420_s1 = inlined_call_operand.vmem [shape: bf16[32,64], index: 1, kind: input, shape index: {}]   ;;  %s421_s2 = inlined_call_operand.vmem [shape: f32[1,64], index: 2, kind: input, shape index: {}]   ;;  %s422_s3 = inlined_call_operand.vmem [shape: bf16[64,32], index: 3, kind: input, shape index: {}]   ;;  %s423_s4 = inlined_call_operand.vmem [shape: f32[1,32], index: 4, kind: input, shape index: {}]   ;;  %s424_s5 = inlined_call_operand.vmem [shape: f32[1,32], index: 5, kind: input, shape index: {}]   ;;  %s425_s6 = inlined_call_operand.vmem [shape: f32[1,32], index: 6, kind: input, shape index: {}]   ;;  %s426_s7 = inlined_call_operand.hbm [shape: f32[16,32], index: 7, kind: output, shape index: {}]  }
   0x1   :  { %v296_v0 = vld [vmem:[%s420_s1 + $0x8] sm:$0xff]   ;;  %271 = vmatprep.subr.bf16.mxu0 %v328_v1  ;;  %v297_v2 = vld [vmem:[%s420_s1] sm:$0xff]   ;;  %279 = vmatprep.subr.bf16.mxu1 %v328_v1  ;;  %v298_v5 = vld [vmem:[%s422_s3 + $0x18] sm:$0xff]  }
   0x2   :  { %272 = vmatpush3.bf16.msra.mxu0 %v296_v0  ;;  %275 = vmatprep.mubr.msk.bf16.mxu0 %vm329_vm0, %v328_v1  ;;  %v28_v3 = vld [vmem:[%s419_s0] sm:$0xff]  ;;  %v29_v4 = vld [vmem:[%s419_s0 + $0x8] sm:$0xff] }
   0x3   :  { %273 = vmatprep.subr.bf16.mxu0 %v328_v1  ;;  %287 = vmatprep.mubr.msk.bf16.mxu1 %vm329_vm0, %v328_v1  ;;  %v30_v6 = vpack.c.bf16 %v29_v4, %v28_v3 }
   0x4   :  { %280 = vmatpush3.bf16.msra.mxu1 %v298_v5 }
   0x5   :  { %281 = vmatprep.subr.bf16.mxu1 %v328_v1 }
   0x6   :  { %274 = vmatpush3.bf16.msra.mxu0 %v297_v2 }
   0x7   :  { %12 = vsyncpa [#allocation3], 0  ;;  %v299_v7 = vld [vmem:[%s422_s3 + $0x10] sm:$0xff]   ;;  %v300_v8 = vld [vmem:[%s422_s3 + $0x8] sm:$0xff]   ;;  %vm141_vm2 = vcmask 523264   ;;  %s330_s20 = smov [#allocation2]  }
   0x8   :  { %282 = vmatpush3.bf16.msra.mxu1 %v299_v7  ;;  %v301_v9 = vld [vmem:[%s422_s3] sm:$0xff]   ;;  %s240_s21 = sshll.u32 %s330_s20, 4  ;;  %s241_s21 = int_to_ptr.vmem [resolvable:$true] %s240_s21 }
   0x9   :  { %276 = vmatmul.mubr.msk.bf16.vlgmr.msra.gmra.mxu0 %vm54_vm1, %v30_v6  ;;  %283 = vmatprep.subr.bf16.mxu1 %v328_v1  ;;  %v251_v10 = vld [vmem:[%s421_s2] ss:$0 sm:$0xff]  ;;  %s306_s22 = scalar_lea.vmem %s241_s21, 256  ;;  %p311_p1 = scmp.lt.s32.totalorder %s241_s21, %s241_s21 }
   0xa   :  { %v255_v20 = vld [vmem:[%s423_s4] ss:$0 sm:$0xff]  ;;  %p307_p0 = scmp.ne.s32.totalorder %s241_s21, %s306_s22  ;;  %p312_p2 = scmp.lt.s32.totalorder %s306_s22, %s306_s22 }
   0xb   :  { %v261_v48 = vld [vmem:[%s424_s5] ss:$0 sm:$0xff] }
   0xc   :  { %284 = vmatpush3.bf16.msra.mxu1 %v300_v8  ;;  %v262_v50 = vld [vmem:[%s425_s6] ss:$0 sm:$0xff]  ;;  %p313_p3 = por %p312_p2, %p311_p1 }
   0xd   :  { %285 = vmatprep.subr.bf16.mxu1 %v328_v1 }
   0xe   :  { %p314_p4 = pnand %p313_p3, %p307_p0 }
  0x10   :  { %286 = vmatpush3.bf16.msra.mxu1 %v301_v9 }
  0xc9   :  { %v92_v11 = vpop.f32.mrf.mxu0 }
  0xca   :  { %v93_v13 = vadd.f32 %v251_v10, %v92_v11 }
  0xcb   :  { %v277_v12 = vpop.f32.mrf.mxu0 }
  0xcc   :  { %v99_v17 = vmax.f32 %v93_v13, 0.0 }
  0xcd   :  { %v95_v14 = vpop.f32.mrf.mxu0 }
  0xce   :  { %v96_v15 = vadd.f32 %v251_v10, %v95_v14 }
  0xcf   :  { %v278_v16 = vpop.f32.mrf.mxu0 }
  0xd0   :  { %v100_v18 = vmax.f32 %v96_v15, 0.0 }
  0xd2   :  { %v101_v19 = vpack.c.bf16 %v100_v18, %v99_v17 }
  0xd4   :  { %288 = vmatmul.mubr.msk.bf16.vlgmr.msra.gmra.mxu1 %vm141_vm2, %v101_v19 }
 0x194   :  { %v179_v21 = vpop.f32.mrf.mxu1 }
 0x195   :  { %v180_v22 = vadd.f32 %v255_v20, %v179_v21 }
 0x196   :  { %v289_v23 = vpop.f32.mrf.mxu1 }
 0x197   :  { %v186_v24 = vadd.f32 %v180_v22, %v28_v3 }
 0x198   :  { %v182_v25 = vpop.f32.mrf.mxu1 }
 0x199   :  { %v183_v26 = vadd.f32 %v255_v20, %v182_v25  ;;  %v188_v27 = vsel %vm54_vm1, %v186_v24, 0.0 }
 0x19a   :  { %189 = vadd.xlane.f32.xlu0 %v188_v27  ;;  %v290_v28 = vpop.f32.mrf.mxu1 }
 0x19b   :  { %v187_v29 = vadd.f32 %v183_v26, %v29_v4 }
 0x19d   :  { %v191_v30 = vsel %vm54_vm1, %v187_v29, 0.0 }
 0x19e   :  { %192 = vadd.xlane.f32.xlu0 %v191_v30 }
 0x223   :  { %v190_v31 = vpop.xlane.xlu0 %189 }
 0x224   :  { %v195_v32 = vmul.f32 0.03125, %v190_v31 }
 0x226   :  { %v197_v33 = vsub.f32 %v186_v24, %v195_v32 }
 0x227   :  { %v193_v34 = vpop.xlane.xlu0 %192 }
 0x228   :  { %v196_v35 = vmul.f32 0.03125, %v193_v34  ;;  %v199_v36 = vmul.f32 %v197_v33, %v197_v33 }
 0x22a   :  { %v198_v37 = vsub.f32 %v187_v29, %v196_v35  ;;  %v201_v38 = vsel %vm54_vm1, %v199_v36, 0.0 }
 0x22b   :  { %202 = vadd.xlane.f32.xlu1 %v201_v38 }
 0x22c   :  { %v200_v39 = vmul.f32 %v198_v37, %v198_v37 }
 0x22e   :  { %v204_v40 = vsel %vm54_vm1, %v200_v39, 0.0 }
 0x22f   :  { %205 = vadd.xlane.f32.xlu1 %v204_v40 }
 0x2b4   :  { %v203_v41 = vpop.xlane.xlu1 %202 }
 0x2b5   :  { %v207_v42 = vmul.f32 0.03125, %v203_v41 }
 0x2b7   :  { %v209_v43 = vadd.f32 1e-05, %v207_v42 }
 0x2b8   :  { %v206_v44 = vpop.xlane.xlu1 %205 }
 0x2b9   :  { %302 = vrsqrt.f32 %v209_v43  ;;  %v208_v45 = vmul.f32 0.03125, %v206_v44 }
 0x2bb   :  { %v210_v46 = vadd.f32 1e-05, %v208_v45 }
 0x2bd   :  { %304 = vrsqrt.f32 %v210_v46 }
 0x2c6   :  { %v303_v47 = vpop.eup %302 }
 0x2c7   :  { %v213_v49 = vmul.f32 %v303_v47, %v197_v33 }
 0x2c9   :  { %v222_v51 = vmul.f32 %v261_v48, %v213_v49 }
 0x2ca   :  { %v305_v52 = vpop.eup %304 }
 0x2cb   :  { %v214_v53 = vmul.f32 %v305_v52, %v198_v37  ;;  %v231_v54 = vadd.f32 %v262_v50, %v222_v51 }
 0x2cd   :  { %v223_v55 = vmul.f32 %v261_v48, %v214_v53  ;;  %233 = vst.msk [vmem:[#allocation2] sm:$0xff] %vm54_vm1, %v231_v54 }
 0x2cf   :  { %v232_v56 = vadd.f32 %v262_v50, %v223_v55 }
 0x2d1   :  { %234 = vst.msk [vmem:[#allocation2 + $0x8] sm:$0xff] %vm54_vm1, %v232_v56 }
 0x2d2   :  { %317 = shalt.err (!%p314_p4)
}
 0x2d3   :  { %s331_s5 = smov 128   ;;  %s332_s6 = smov 8  }
 0x2d4   :  { %246 = dma.vmem_to_hbm [thread:$0]  %s241_s21, 256, %s426_s7, [#allocation3], %s331_s5, %s331_s5, %s332_s6  }
 0x2d5   :  { %326 = dma.done.wait [#allocation3], 256  }
 0x2d6   :  { %327 = vsyncadd [#allocation3], 4294967040 }
 0x2d7   :  { %250 = vsyncpa [#allocation3], 1 }

// kernel: encoder_decoder_forward.10
= control target key start
LH: loop header
LB: loop body
LE: loop exit
PB: predicated region body
PF: predicated region fallthrough
CT: control target
= control target key end

     0   :  { %s1583_s17 = smov 0   ;;  %s1773_s0 = inlined_call_operand.vmem [shape: f32[2,8,32], index: 0, kind: input, shape index: {}, may-alias: {0,1}]   ;;  %s1774_s1 = inlined_call_operand.vmem [shape: f32[2,8,32], index: 1, kind: input, shape index: {}, may-alias: {0,1}]   ;;  %s1775_s2 = inlined_call_operand.vmem [shape: f32[2,1,8], index: 2, kind: input, shape index: {}]   ;;  %s1776_s3 = inlined_call_operand.vmem [shape: bf16[32,32], index: 3, kind: input, shape index: {}]   ;;  %s1777_s4 = inlined_call_operand.vmem [shape: f32[1,32], index: 4, kind: input, shape index: {}]   ;;  %s1778_s5 = inlined_call_operand.vmem [shape: bf16[32,64], index: 5, kind: input, shape index: {}]   ;;  %s1779_s6 = inlined_call_operand.vmem [shape: f32[1,64], index: 6, kind: input, shape index: {}]   ;;  %s1780_s7 = inlined_call_operand.vmem [shape: bf16[32,32], index: 7, kind: input, shape index: {}]   ;;  %s1781_s8 = inlined_call_operand.vmem [shape: f32[1,32], index: 8, kind: input, shape index: {}]   ;;  %s1782_s9 = inlined_call_operand.vmem [shape: f32[1,32], index: 9, kind: input, shape index: {}]   ;;  %s1783_s10 = inlined_call_operand.vmem [shape: f32[1,32], index: 10, kind: input, shape index: {}]   ;;  %s1784_s11 = inlined_call_operand.vmem [shape: f32[2,8,32], index: 11, kind: output, shape index: {}]  }
   0x1 LB: > { %s1314_s18 = sadd.s32 4294967295, %s1511_s17   ;;  %p1318_p0 = scmp.ge.s32.totalorder %s1511_s17, 1  ;;  %s1511_s17 = sphi %s1583_s17, %s21_s17  }
   0x2   : > { %p353_p1 = scmp.lt.s32.totalorder %s1511_s17, 3 }
   0x4   : > { %p354_p2 = pnand %p1318_p0, %p353_p1 }
   0x5   : > { %p398_p3 = scmp.lt.s32.totalorder (!%p354_p2), %s1314_s18, 1  ;;  %s1515_s21 = smov (!%p354_p2), 120  }
   0x6   : > { %357 = sbr.rel (%p354_p2) target bundleno = 2778 (0xada), region = 64  ;;  %s1518_s25 = smov (!%p354_p2), 88  }
   0x7   : > { %s1519_s26 = smov (!%p354_p2), 112   ;;  %s1520_s13 = smov (!%p354_p2), 80  }
   0x8   : > { %s1522_s19 = smov (!%p354_p2), 72  }
   0xb   : > { %v1483_v0 = vld [vmem:[%s1778_s5 + $0x8] sm:$0xff]   ;;  %v1513_v1 = vmov 0.0   ;;  %v1485_v3 = vld [vmem:[%s1778_s5] sm:$0xff]   ;;  %vm1514_vm0 = vmmov 0   ;;  %s1786_s18 = smov (!%p398_p3, %s1314_s18), 1  ;;  %vm441_vm1 = vcmask 261120   ;;  %v604_v28 = vlaneseq }
   0xc   : > { %1385 = vmatprep.subr.bf16.mxu1 %v1513_v1  ;;  %1377 = vmatprep.subr.bf16.mxu0 %v1513_v1  ;;  %v1484_v2 = vld [vmem:[%s1776_s3 + $0x8] sm:$0xff]   ;;  %v1486_v4 = vld [vmem:[%s1776_s3] sm:$0xff]   ;;  %s1614_s27 = sshll.u32 %s1786_s18, 3  ;;  %vm555_vm2 = vcmask 64512   ;;  %s408_s24 = scalar_lea.vmem %s1775_s2, %s1786_s18  ;;  %v1516_v32 = vmov 0   ;;  %vm628_vm5 = vcmask 1043456  }
   0xd   : > { %1386 = vmatpush3.bf16.msra.mxu1 %v1483_v0  ;;  %1389 = vmatprep.mubr.msk.bf16.mxu1 %vm1514_vm0, %v1513_v1  ;;  %s405_s30 = scalar_lea.vmem %s1774_s1, %s1614_s27  ;;  %s401_s14 = scalar_lea.vmem %s1773_s0, %s1614_s27  ;;  %v1326_v9 = vld [vmem:[%s1779_s6] ss:$0 sm:$0xff]  ;;  %v605_v30 = vshrl.u32 %v604_v28, 7  ;;  %v787_v63 = vld [vmem:[%s1780_s7 + $0x4] sm:$0xf] }
   0xe   : > { %1378 = vmatpush3.bf16.msra.mxu0 %v1484_v2  ;;  %1387 = vmatprep.subr.bf16.mxu1 %v1513_v1  ;;  %v415_v5 = vld [vmem:[%s405_s30] sm:$0xff]  ;;  %s1517_s18 = smov 96   ;;  %v792_v0 = vsel %vm628_vm5, %v787_v63, 0  ;;  %s412_s30 = scalar_lea.vmem %s1784_s11, %s1614_s27 }
   0xf   : > { %1379 = vmatprep.subr.bf16.mxu0 %v1513_v1  ;;  %1381 = vmatprep.mubr.msk.bf16.mxu0 %vm1514_vm0, %v1513_v1  ;;  %v485_v6 = vpack.c.bf16 %v415_v5, %v415_v5  ;;  %v1626_v7 = vld [vmem:[%s401_s14] sm:$0xff]  ;;  %v606_v31 = vsub.s32 0, %v605_v30  ;;  %s1521_s14 = smov 104  }
  0x10   : > { %v417_v8 = vpack.c.bf16 %v1626_v7, %v1626_v7  ;;  %v1322_v10 = vld [vmem:[%s1777_s4] ss:$0 sm:$0xff] }
  0x11   : > { %1388 = vmatpush3.bf16.msra.mxu1 %v1485_v3  ;;  %v416_v29 = vld [vmem:[%s408_s24] sm:$0x1] }
  0x12   : > { %1380 = vmatpush3.bf16.msra.mxu0 %v1486_v4  ;;  %1399 = vmatprep.subr.bf16.mxu1 %v1513_v1  ;;  %vm602_vm3 = vcmp.gt.f32.partialorder %v416_v29, 0.5 }
  0x13   : > { %1393 = vmatprep.subr.bf16.mxu0 %v1513_v1  ;;  %v603_v33 = vsel %vm602_vm3, 1, %v1516_v32 }
  0x14   : > { %1390 = vmatmul.mubr.msk.bf16.vlgmr.msra.gmra.mxu1 %vm441_vm1, %v485_v6  ;;  %v1664_v34 = vrot.slane %v603_v33, %v606_v31  ;;  %v673_v6 = vld [vmem:[%s1780_s7] sm:$0xf] }
  0x15   : > { %1382 = vmatmul.mubr.msk.bf16.vlgmr.msra.gmra.mxu0 %vm441_vm1, %v417_v8  ;;  %1401 = vmatprep.mubr.msk.bf16.mxu1 %vm1514_vm0, %v1513_v1 }
  0x16   : > { %1395 = vmatprep.mubr.msk.bf16.mxu0 %vm1514_vm0, %v1513_v1  ;;  %vm608_vm4 = vcmp.eq.s32.totalorder %v1664_v34, 1 }
  0xd4   : > { %v546_v11 = vpop.f32.mrf.mxu1 }
  0xd5   : > { %v547_v12 = vadd.f32 %v1326_v9, %v546_v11  ;;  %v479_v13 = vpop.f32.mrf.mxu0 }
  0xd6   : > { %v480_v14 = vadd.f32 %v1322_v10, %v479_v13  ;;  %v1391_v15 = vpop.f32.mrf.mxu1  ;;  %v838_v10 = vsel %vm628_vm5, %v673_v6, 0 }
  0xd7   : > { %v1642_v16 = vpack.c.bf16 %v547_v12, %v547_v12  ;;  %v1383_v17 = vpop.f32.mrf.mxu0 }
  0xd8   : > { %v552_v18 = vmul.f32 0.35355338, %v480_v14  ;;  %v549_v19 = vpop.f32.mrf.mxu1 }
  0xd9   : > { %677 = vrot.lane.b32.xlu0 %v1642_v16, %s1515_s21  ;;  %v482_v20 = vpop.f32.mrf.mxu0  ;;  %v560_v21 = vsel %vm555_vm2, %v1642_v16, 0 }
  0xda   : > { %v1647_v22 = vpack.c.bf16 %v552_v18, %v552_v18  ;;  %v1392_v23 = vpop.f32.mrf.mxu1  ;;  %1394 = vmatpush3.bf16.xpose.msra.mxu0 %v560_v21 }
  0xdb   : > { %v1384_v24 = vpop.f32.mrf.mxu0  ;;  %1405 = vmatprep.subr.bf16.mxu0 %v1513_v1 }
  0xdd   : > { %675 = vrot.lane.b32.xlu0 %v1647_v22, %s1515_s21 }
  0xe1   : > { %1396 = vmatmul.mubr.msk.bf16.vlgmr.msra.gmra.mxu0 %vm555_vm2, %v1647_v22 }
  0xe2   : > { %1407 = vmatprep.mubr.msk.bf16.mxu0 %vm1514_vm0, %v1513_v1 }
 0x14b   : > { %v678_v25 = vpop.permute.xlu0 %677 }
 0x14c   : > { %v683_v26 = vsel %vm555_vm2, %v678_v25, 0 }
 0x14d   : > { %1406 = vmatpush3.bf16.xpose.msra.mxu0 %v683_v26 }
 0x14e   : > { %1417 = vmatprep.subr.bf16.mxu0 %v1513_v1 }
 0x14f   : > { %v676_v27 = vpop.permute.xlu0 %675 }
 0x154   : > { %1408 = vmatmul.mubr.msk.bf16.vlgmr.msra.gmra.mxu0 %vm555_vm2, %v676_v27 }
 0x155   : > { %1419 = vmatprep.mubr.msk.bf16.mxu0 %vm1514_vm0, %v1513_v1  ;;  %1418 = vmatpush3.bf16.msra.mxu0 %v792_v0 }
 0x156   : > { %1429 = vmatprep.subr.bf16.mxu0 %v1513_v1 }
 0x1a1   : > { %v596_v35 = vpop.f32.mrf.mxu0 }
 0x1a2   : > { %v609_v36 = vsel %vm608_vm4, %v596_v35, -1e+09 }
 0x1a3   : > { %v1397_v37 = vpop.f32.mrf.mxu0  ;;  %v610_v38 = vsel %vm555_vm2, %v609_v36, -inf }
 0x1a4   : > { %611 = vmax.xlane.f32.xlu1 %v610_v38 }
 0x1a5   : > { %v599_v39 = vpop.f32.mrf.mxu0 }
 0x1a7   : > { %v1398_v40 = vpop.f32.mrf.mxu0 }
 0x214   : > { %v719_v41 = vpop.f32.mrf.mxu0 }
 0x215   : > { %v725_v42 = vsel %vm608_vm4, %v719_v41, -1e+09 }
 0x216   : > { %v1409_v43 = vpop.f32.mrf.mxu0  ;;  %v726_v44 = vsel %vm555_vm2, %v725_v42, -inf }
 0x217   : > { %727 = vmax.xlane.f32.xlu1 %v726_v44 }
 0x218   : > { %v722_v45 = vpop.f32.mrf.mxu0 }
 0x21a   : > { %v1410_v46 = vpop.f32.mrf.mxu0 }
 0x228   : > { %623 = vrot.lane.b32.xlu1 %v1642_v16, %s1517_s18 }
 0x22d   : > { %v612_v47 = vpop.xlane.xlu1 %611 }
 0x22e   : > { %v613_v48 = vsub.f32 %v609_v36, %v612_v47 }
 0x230   : > { %v614_v49 = vmul.f32 1.442695, %v613_v48 }
 0x232   : > { %1487 = vpow2.f32 %v614_v49 }
 0x23f   : > { %v1488_v50 = vpop.eup %1487 }
 0x240   : > { %v616_v51 = vsel %vm555_vm2, %v1488_v50, 0.0 }
 0x241   : > { %617 = vadd.xlane.f32.xlu0 %v616_v51 }
 0x2a0   : > { %v728_v52 = vpop.xlane.xlu1 %727 }
 0x2a1   : > { %v729_v53 = vsub.f32 %v725_v42, %v728_v52 }
 0x2a3   : > { %v730_v54 = vmul.f32 1.442695, %v729_v53 }
 0x2a4   : > { %v624_v55 = vpop.permute.xlu1 %623 }
 0x2a5   : > { %1489 = vpow2.f32 %v730_v54  ;;  %v630_v56 = vsel %vm628_vm5, %v624_v55, 0  ;;  %v992_v54 = vld [vmem:[%s1780_s7 + $0x8] sm:$0xf] }
 0x2a6   : > { %1400 = vmatpush3.bf16.msra.mxu1 %v630_v56  ;;  %v997_v55 = vsel %vm628_vm5, %v992_v54, 0 }
 0x2a7   : > { %1411 = vmatprep.subr.bf16.mxu1 %v1513_v1 }
 0x2b2   : > { %v1490_v57 = vpop.eup %1489 }
 0x2b3   : > { %v732_v58 = vsel %vm555_vm2, %v1490_v57, 0.0 }
 0x2b4   : > { %733 = vadd.xlane.f32.xlu1 %v732_v58 }
 0x2c5   : > { %738 = vrot.lane.b32.xlu1 %v1642_v16, %s1518_s25 }
 0x2c9   : > { %882 = vrot.lane.b32.xlu1 %v1642_v16, %s1519_s26 }
 0x2ca   : > { %v618_v59 = vpop.xlane.xlu0 %617 }
 0x2cb   : > { %1491 = vrcp.f32 %v618_v59 }
 0x2cd   : > { %880 = vrot.lane.b32.xlu1 %v1647_v22, %s1519_s26 }
 0x2d8   : > { %v1492_v60 = vpop.eup %1491 }
 0x2d9   : > { %v620_v61 = vmul.f32 %v1492_v60, %v1488_v50 }
 0x2db   : > { %v621_v62 = vpack.c.bf16 %v620_v61, %v620_v61 }
 0x2dd   : > { %1402 = vmatmul.mubr.msk.bf16.vlgmr.msra.gmra.mxu1 %vm555_vm2, %v621_v62 }
 0x2de   : > { %1413 = vmatprep.mubr.msk.bf16.mxu1 %vm1514_vm0, %v1513_v1 }
 0x33d   : > { %v734_v2 = vpop.xlane.xlu1 %733 }
 0x33e   : > { %1493 = vrcp.f32 %v734_v2 }
 0x341   : > { %v739_v3 = vpop.permute.xlu1 %738 }
 0x342   : > { %v744_v4 = vsel %vm628_vm5, %v739_v3, 0 }
 0x343   : > { %1412 = vmatpush3.bf16.msra.mxu1 %v744_v4 }
 0x344   : > { %1423 = vmatprep.subr.bf16.mxu1 %v1513_v1 }
 0x345   : > { %v883_v17 = vpop.permute.xlu1 %882 }
 0x346   : > { %v888_v21 = vsel %vm555_vm2, %v883_v17, 0 }
 0x349   : > { %v881_v25 = vpop.permute.xlu1 %880 }
 0x34b   : > { %v1494_v5 = vpop.eup %1493 }
 0x34c   : > { %v736_v8 = vmul.f32 %v1494_v5, %v1490_v57 }
 0x34e   : > { %v737_v9 = vpack.c.bf16 %v736_v8, %v736_v8 }
 0x350   : > { %1414 = vmatmul.mubr.msk.bf16.vlgmr.msra.gmra.mxu1 %vm555_vm2, %v737_v9 }
 0x351   : > { %1424 = vmatpush3.bf16.msra.mxu1 %v838_v10  ;;  %1425 = vmatprep.mubr.msk.bf16.mxu1 %vm1514_vm0, %v1513_v1 }
 0x352   : > { %1435 = vmatprep.subr.bf16.mxu1 %v1513_v1 }
 0x39d   : > { %v666_v11 = vpop.f32.mrf.mxu1 }
 0x39e   : > { %v672_v12 = vpack.c.bf16 %v666_v11, %v666_v11  ;;  %v1152_v11 = vld [vmem:[%s1780_s7 + $0xc] sm:$0xf] }
 0x39f   : > { %v1403_v13 = vpop.f32.mrf.mxu1 }
 0x3a0   : > { %1426 = vmatmul.mubr.msk.bf16.vlgmr.msra.gmra.mxu1 %vm555_vm2, %v672_v12  ;;  %v1157_v13 = vsel %vm628_vm5, %v1152_v11, 0 }
 0x3a1   : > { %v669_v14 = vpop.f32.mrf.mxu1  ;;  %1437 = vmatprep.mubr.msk.bf16.mxu1 %vm1514_vm0, %v1513_v1 }
 0x3a3   : > { %v1404_v15 = vpop.f32.mrf.mxu1 }
 0x410   : > { %v780_v18 = vpop.f32.mrf.mxu1 }
 0x411   : > { %v786_v19 = vpack.c.bf16 %v780_v18, %v780_v18 }
 0x412   : > { %v1415_v20 = vpop.f32.mrf.mxu1 }
 0x413   : > { %1420 = vmatmul.mubr.msk.bf16.vlgmr.msra.gmra.mxu0 %vm555_vm2, %v786_v19 }
 0x414   : > { %1430 = vmatpush3.bf16.xpose.msra.mxu0 %v888_v21  ;;  %v783_v23 = vpop.f32.mrf.mxu1  ;;  %1431 = vmatprep.mubr.msk.bf16.mxu0 %vm1514_vm0, %v1513_v1 }
 0x415   : > { %1441 = vmatprep.subr.bf16.mxu0 %v1513_v1 }
 0x416   : > { %v1416_v24 = vpop.f32.mrf.mxu1 }
 0x41b   : > { %1432 = vmatmul.mubr.msk.bf16.vlgmr.msra.gmra.mxu0 %vm555_vm2, %v881_v25 }
 0x41c   : > { %1443 = vmatprep.mubr.msk.bf16.mxu0 %vm1514_vm0, %v1513_v1  ;;  %1442 = vmatpush3.bf16.msra.mxu0 %v997_v55 }
 0x41d   : > { %1453 = vmatprep.subr.bf16.mxu0 %v1513_v1 }
 0x460   : > { %v1710_v26 = vpop.f32.mrf.mxu1 }
 0x462   : > { %v1427_v27 = vpop.f32.mrf.mxu1 }
 0x464   : > { %v877_v28 = vpop.f32.mrf.mxu1 }
 0x466   : > { %v1428_v29 = vpop.f32.mrf.mxu1 }
 0x467   : > { %v1342_v29 = vld [vmem:[%s1781_s8] ss:$0 sm:$0xff] }
 0x4d3   : > { %v1712_v30 = vpop.f32.mrf.mxu0 }
 0x4d5   : > { %v1421_v31 = vpop.f32.mrf.mxu0 }
 0x4d7   : > { %v831_v32 = vpop.f32.mrf.mxu0 }
 0x4d9   : > { %v1422_v33 = vpop.f32.mrf.mxu0 }
 0x4db   : > { %v924_v35 = vpop.f32.mrf.mxu0 }
 0x4dc   : > { %v930_v36 = vsel %vm608_vm4, %v924_v35, -1e+09 }
 0x4dd   : > { %v1433_v37 = vpop.f32.mrf.mxu0  ;;  %v931_v38 = vsel %vm555_vm2, %v930_v36, -inf }
 0x4de   : > { %932 = vmax.xlane.f32.xlu0 %v931_v38 }
 0x4df   : > { %v927_v39 = vpop.f32.mrf.mxu0 }
 0x4e1   : > { %v1434_v40 = vpop.f32.mrf.mxu0 }
 0x4f4   : > { %943 = vrot.lane.b32.xlu0 %v1642_v16, %s1520_s13 }
 0x4f8   : > { %1042 = vrot.lane.b32.xlu0 %v1642_v16, %s1521_s14 }
 0x4fc   : > { %1040 = vrot.lane.b32.xlu0 %v1647_v22, %s1521_s14 }
 0x567   : > { %v933_v41 = vpop.xlane.xlu0 %932 }
 0x568   : > { %v934_v42 = vsub.f32 %v930_v36, %v933_v41 }
 0x56a   : > { %v935_v43 = vmul.f32 1.442695, %v934_v42 }
 0x56b   : > { %v944_v44 = vpop.permute.xlu0 %943 }
 0x56c   : > { %1495 = vpow2.f32 %v935_v43  ;;  %v949_v45 = vsel %vm628_vm5, %v944_v44, 0 }
 0x56d   : > { %1436 = vmatpush3.bf16.msra.mxu1 %v949_v45 }
 0x56e   : > { %1447 = vmatprep.subr.bf16.mxu1 %v1513_v1 }
 0x56f   : > { %v1043_v51 = vpop.permute.xlu0 %1042 }
 0x570   : > { %v1048_v52 = vsel %vm555_vm2, %v1043_v51, 0 }
 0x573   : > { %v1041_v53 = vpop.permute.xlu0 %1040 }
 0x579   : > { %v1496_v46 = vpop.eup %1495 }
 0x57a   : > { %v937_v47 = vsel %vm555_vm2, %v1496_v46, 0.0 }
 0x57b   : > { %938 = vadd.xlane.f32.xlu1 %v937_v47 }
 0x604   : > { %v939_v48 = vpop.xlane.xlu1 %938 }
 0x605   : > { %1497 = vrcp.f32 %v939_v48  ;;  %v1344_v48 = vld [vmem:[%s1783_s10] ss:$0 sm:$0xff] }
 0x612   : > { %v1498_v49 = vpop.eup %1497 }
 0x613   : > { %v941_v50 = vmul.f32 %v1498_v49, %v1496_v46 }
 0x615   : > { %v942_v22 = vpack.c.bf16 %v941_v50, %v941_v50 }
 0x617   : > { %1438 = vmatmul.mubr.msk.bf16.vlgmr.msra.gmra.mxu1 %vm555_vm2, %v942_v22 }
 0x618   : > { %1448 = vmatpush3.bf16.xpose.msra.mxu1 %v1048_v52  ;;  %1449 = vmatprep.mubr.msk.bf16.mxu1 %vm1514_vm0, %v1513_v1 }
 0x619   : > { %1459 = vmatprep.subr.bf16.mxu1 %v1513_v1 }
 0x61f   : > { %1450 = vmatmul.mubr.msk.bf16.vlgmr.msra.gmra.mxu1 %vm555_vm2, %v1041_v53 }
 0x620   : > { %1461 = vmatprep.mubr.msk.bf16.mxu1 %vm1514_vm0, %v1513_v1  ;;  %1460 = vmatpush3.bf16.msra.mxu1 %v1157_v13 }
 0x6d7   : > { %v985_v56 = vpop.f32.mrf.mxu1 }
 0x6d8   : > { %v991_v57 = vpack.c.bf16 %v985_v56, %v985_v56 }
 0x6d9   : > { %v1439_v58 = vpop.f32.mrf.mxu1 }
 0x6da   : > { %1444 = vmatmul.mubr.msk.bf16.vlgmr.msra.gmra.mxu0 %vm555_vm2, %v991_v57 }
 0x6db   : > { %v988_v59 = vpop.f32.mrf.mxu1  ;;  %1455 = vmatprep.mubr.msk.bf16.mxu0 %vm1514_vm0, %v1513_v1  ;;  %v875_v1 = vadd.f32 %v1710_v26, %v1712_v30 }
 0x6dd   : > { %v1440_v60 = vpop.f32.mrf.mxu1 }
 0x6df   : > { %v1084_v61 = vpop.f32.mrf.mxu1 }
 0x6e0   : > { %v1090_v62 = vsel %vm608_vm4, %v1084_v61, -1e+09 }
 0x6e1   : > { %v1451_v63 = vpop.f32.mrf.mxu1  ;;  %v1091_v0 = vsel %vm555_vm2, %v1090_v62, -inf }
 0x6e2   : > { %1092 = vmax.xlane.f32.xlu0 %v1091_v0 }
 0x6e3   : > { %v1087_v2 = vpop.f32.mrf.mxu1 }
 0x6e5   : > { %v1452_v3 = vpop.f32.mrf.mxu1 }
 0x76b   : > { %v1093_v4 = vpop.xlane.xlu0 %1092 }
 0x76c   : > { %v1094_v5 = vsub.f32 %v1090_v62, %v1093_v4 }
 0x76e   : > { %v1095_v6 = vmul.f32 1.442695, %v1094_v5 }
 0x770   : > { %1499 = vpow2.f32 %v1095_v6 }
 0x77d   : > { %v1500_v8 = vpop.eup %1499 }
 0x77e   : > { %v1097_v9 = vsel %vm555_vm2, %v1500_v8, 0.0 }
 0x77f   : > { %1098 = vadd.xlane.f32.xlu1 %v1097_v9 }
 0x790   : > { %1103 = vrot.lane.b32.xlu1 %v1642_v16, %s1522_s19 }
 0x79a   : > { %v1033_v34 = vpop.f32.mrf.mxu0 }
 0x79b   : > { %v1039_v10 = vadd.f32 %v1033_v34, %v875_v1 }
 0x79c   : > { %v1445_v12 = vpop.f32.mrf.mxu0 }
 0x79e   : > { %v1036_v14 = vpop.f32.mrf.mxu0 }
 0x7a0   : > { %v1446_v15 = vpop.f32.mrf.mxu0 }
 0x808   : > { %v1099_v17 = vpop.xlane.xlu1 %1098 }
 0x809   : > { %1501 = vrcp.f32 %v1099_v17 }
 0x80c   : > { %v1104_v18 = vpop.permute.xlu1 %1103 }
 0x80d   : > { %v1109_v16 = vsel %vm628_vm5, %v1104_v18, 0 }
 0x80e   : > { %1454 = vmatpush3.bf16.msra.mxu0 %v1109_v16 }
 0x816   : > { %v1502_v19 = vpop.eup %1501 }
 0x817   : > { %v1101_v20 = vmul.f32 %v1502_v19, %v1500_v8 }
 0x819   : > { %v1102_v21 = vpack.c.bf16 %v1101_v20, %v1101_v20 }
 0x81b   : > { %1456 = vmatmul.mubr.msk.bf16.vlgmr.msra.gmra.mxu0 %vm555_vm2, %v1102_v21 }
 0x8db   : > { %v1145_v23 = vpop.f32.mrf.mxu0 }
 0x8dc   : > { %v1151_v24 = vpack.c.bf16 %v1145_v23, %v1145_v23 }
 0x8dd   : > { %v1457_v25 = vpop.f32.mrf.mxu0 }
 0x8de   : > { %1462 = vmatmul.mubr.msk.bf16.vlgmr.msra.gmra.mxu1 %vm555_vm2, %v1151_v24 }
 0x8df   : > { %v1148_v26 = vpop.f32.mrf.mxu0 }
 0x8e1   : > { %v1458_v27 = vpop.f32.mrf.mxu0 }
 0x99e   : > { %v1193_v28 = vpop.f32.mrf.mxu1 }
 0x99f   : > { %v1199_v30 = vadd.f32 %v1193_v28, %v1039_v10 }
 0x9a0   : > { %v1463_v31 = vpop.f32.mrf.mxu1 }
 0x9a1   : > { %v1207_v32 = vadd.f32 %v1342_v29, %v1199_v30 }
 0x9a2   : > { %v1196_v33 = vpop.f32.mrf.mxu1 }
 0x9a3   : > { %v1208_v35 = vadd.f32 %v1207_v32, %v1626_v7  ;;  %v1343_v7 = vld [vmem:[%s1782_s9] ss:$0 sm:$0xff] }
 0x9a4   : > { %v1464_v36 = vpop.f32.mrf.mxu1 }
 0x9a5   : > { %v1209_v37 = vsel %vm441_vm1, %v1208_v35, 0.0 }
 0x9a6   : > { %1210 = vadd.xlane.f32.xlu1 %v1209_v37 }
 0xa2f   : > { %v1211_v38 = vpop.xlane.xlu1 %1210 }
 0xa30   : > { %v1213_v39 = vmul.f32 0.03125, %v1211_v38 }
 0xa32   : > { %v1214_v40 = vsub.f32 %v1208_v35, %v1213_v39 }
 0xa34   : > { %v1215_v41 = vmul.f32 %v1214_v40, %v1214_v40 }
 0xa36   : > { %v1216_v42 = vsel %vm441_vm1, %v1215_v41, 0.0 }
 0xa37   : > { %1217 = vadd.xlane.f32.xlu0 %v1216_v42 }
 0xac0   : > { %v1218_v43 = vpop.xlane.xlu0 %1217 }
 0xac1   : > { %v1219_v44 = vmul.f32 0.03125, %v1218_v43 }
 0xac3   : > { %v1220_v45 = vadd.f32 1e-05, %v1219_v44 }
 0xac5   : > { %1503 = vrsqrt.f32 %v1220_v45 }
 0xad2   : > { %v1504_v46 = vpop.eup %1503 }
 0xad3   : > { %v1222_v47 = vmul.f32 %v1504_v46, %v1214_v40 }
 0xad5   : > { %v1230_v49 = vmul.f32 %v1343_v7, %v1222_v47 }
 0xad7   : > { %v1238_v50 = vadd.f32 %v1344_v48, %v1230_v49 }
 0xad9   : > { %1239 = vst.msk [vmem:[%s412_s30] sm:$0xff] %vm441_vm1, %v1238_v50 }
 0xada PF: > { %s21_s17 = sadd.s32 1, %s1511_s17  }
 0xadb   : > { %p18_p4 = scmp.ge.s32.totalorder %s21_s17, 4  }
 0xadd   :  { %20 = sbr.rel (!%p18_p4) target bundleno = 1 (0x1), region = 100 }

</bundles_post_ra>
